<compile_context>
chip_gen: v5e
topology: v5e:2x2
jax: 0.10.0
libtpu: 0.0.40
codegen_flags: <defaults>
</compile_context>

<pallas_src>
import math

import jax
import jax.numpy as jnp
from jax import lax
from jax.experimental import pallas as pl
from jax.experimental.pallas import tpu as pltpu

NEG_SLOPE = 0.01  # nn.LeakyReLU() default


def _leaky_relu(v):
    return jnp.where(v >= 0, v, NEG_SLOPE * v)


# ----------------------------------------------------------------------------
# Pallas kernel: one time-chunk per grid step.  Hoisted precompute feeds a
# light recurrent fori_loop; the hidden state carries across chunks in VMEM.
# ----------------------------------------------------------------------------
def _make_grud_kernel(t_blk, bb, D, H):
    def kernel(seq_ref,    # (4, t_blk*bb, D) f32, time-major rows [x, m, delta, x_prev]
               h0_ref,     # (bb, H) f32
               wg_ref,     # (D, D+H) bf16 : [Wgx | Wgh]
               bg_ref,     # (1, D+H) f32  : [bgx | bgh]
               wx_ref,     # (D, 3H) bf16 : x-row blocks of [Wz | Wr | Wt]
               wm_ref,     # (D, 3H) bf16 : m-row blocks of [Wz | Wr | Wt]
               ball_ref,   # (1, 3H) f32  : [bz | br | bt]
               wzh_ref,    # (H, H) bf16 : h-row block of Wz
               wrh_ref,    # (H, H) bf16 : h-row block of Wr
               wth_ref,    # (H, H) bf16 : h-row block of Wt
               xmean_ref,  # (1, D) f32
               hseq_ref,   # out: (t_blk*bb, H) f32, time-major rows
               gh_scr, az_scr, ar_scr, at_scr,   # (t_blk*bb, H) f32 scratch
               h_scr):     # (bb, H) f32 scratch: hidden-state carry
        tc = pl.program_id(0)

        @pl.when(tc == 0)
        def _():
            h_scr[...] = h0_ref[...]

        # -------- hoisted, h-independent precompute for the whole chunk ------
        x = seq_ref[0]      # (N, D), N = t_blk*bb
        m = seq_ref[1]
        d = seq_ref[2]
        xp = seq_ref[3]

        gam = jnp.exp(-jnp.maximum(
            0.0,
            jnp.dot(d.astype(jnp.bfloat16), wg_ref[...],
                    preferred_element_type=jnp.float32) + bg_ref[...]))
        gx = gam[:, :D]                  # gamma_x  (N, D)
        gh_scr[...] = gam[:, D:]         # gamma_h  (N, H)

        x_imp = m * x + (1.0 - m) * (gx * xp + (1.0 - gx) * xmean_ref[...])

        acts = (jnp.dot(x_imp.astype(jnp.bfloat16), wx_ref[...],
                        preferred_element_type=jnp.float32)
                + jnp.dot(m.astype(jnp.bfloat16), wm_ref[...],
                          preferred_element_type=jnp.float32)
                + ball_ref[...])         # (N, 3H), f32
        az_scr[...] = acts[:, :H]
        ar_scr[...] = acts[:, H:2 * H]
        at_scr[...] = acts[:, 2 * H:]

        wzh = wzh_ref[...]
        wrh = wrh_ref[...]
        wth = wth_ref[...]

        # ---------------- light, h-dependent recurrent loop ------------------
        def step(t, h):
            start = pl.multiple_of(t * bb, 8)   # bb is a multiple of 8
            rows = pl.ds(start, bb)

            hd = gh_scr[rows, :] * h            # decayed hidden (f32)
            hdb = hd.astype(jnp.bfloat16)
            z = jax.nn.sigmoid(
                az_scr[rows, :]
                + jnp.dot(hdb, wzh, preferred_element_type=jnp.float32))
            r = jax.nn.sigmoid(
                ar_scr[rows, :]
                + jnp.dot(hdb, wrh, preferred_element_type=jnp.float32))
            tilde = jnp.tanh(
                at_scr[rows, :]
                + jnp.dot((r * hd).astype(jnp.bfloat16), wth,
                          preferred_element_type=jnp.float32))
            h_new = (1.0 - z) * hd + z * tilde
            hseq_ref[rows, :] = h_new
            return h_new

        h_final = lax.fori_loop(0, t_blk, step, h_scr[...],
                                unroll=min(8, t_blk))
        h_scr[...] = h_final

    return kernel


# ----------------------------------------------------------------------------
# VMEM-aware chunk planning
# ----------------------------------------------------------------------------
def _plan_chunks(T, B_pad, D, H):
    try:
        phys_vmem = int(pltpu.get_tpu_info().vmem_capacity_bytes)
    except Exception:
        phys_vmem = 64 * 1024 * 1024          # conservative (v7x per-TC)
    budget = phys_vmem // 2                   # leave headroom for compiler scratch

    # bytes per unit of t_blk: seq-in (x2 double-buffered) + out (x2) +
    # 4 scratch slabs + transient precompute values (gamma / x_imp / acts).
    per_t = B_pad * (32 * D + 24 * H)
    per_t += B_pad * (16 * D + 20 * H)
    w_bytes = (2 * (D * (D + H) + 2 * D * 3 * H + 3 * H * H)     # bf16 slabs
               + 4 * (2 * D + 4 * H)                             # f32 biases/xmean
               + 4 * B_pad * H)                                  # h0 + carry
    avail = max(budget - 2 * w_bytes - (1 << 20), per_t)
    t_max = int(max(1, min(avail // per_t, 512, T)))

    nc = -(-T // t_max)                       # number of time chunks
    t_blk = -(-T // nc)                       # minimizes tail padding
    T_pad = nc * t_blk

    vmem_need = per_t * t_blk + 2 * w_bytes
    vmem_limit = int(min(phys_vmem * 0.85,
                         max(vmem_need + (8 << 20), 16 << 20)))
    return t_blk, nc, T_pad, vmem_limit


# ----------------------------------------------------------------------------
# Wrapper
# ----------------------------------------------------------------------------
def grud_forward(inputs, h0, params):
    """Returns (outputs, tr_out, aux_out, hidden) like GRUD.forward."""
    inputs = inputs.astype(jnp.float32)
    h0 = h0.astype(jnp.float32)
    B, C, T, D = inputs.shape
    assert C == 4
    H = params["wgh"].shape[1]

    B_pad = -(-B // 8) * 8                    # sublane-align the batch
    t_blk, nc, T_pad, vmem_limit = _plan_chunks(T, B_pad, D, H)

    # one fused pass: (B,4,T,D) -> time-major flattened (4, T_pad*B_pad, D)
    seq = jnp.transpose(inputs, (1, 2, 0, 3))                 # (4, T, B, D)
    if T_pad != T or B_pad != B:
        seq = jnp.pad(seq, ((0, 0), (0, T_pad - T), (0, B_pad - B), (0, 0)))
    seq = seq.reshape(4, T_pad * B_pad, D)
    h0p = jnp.pad(h0, ((0, B_pad - B), (0, 0))) if B_pad != B else h0

    # ---- weight slabs (row-block split of the fused GRU-D projections) ----
    wz, wr, wt = params["wz"], params["wr"], params["wt"]     # (2D+H, H) each
    bf16 = lambda a: a.astype(jnp.bfloat16)
    wg = bf16(jnp.concatenate([params["wgx"], params["wgh"]], axis=1))   # (D, D+H)
    bg = jnp.concatenate([params["bgx"], params["bgh"]], axis=1)         # (1, D+H)
    wx_all = bf16(jnp.concatenate([wz[:D], wr[:D], wt[:D]], axis=1))     # (D, 3H)
    wm_all = bf16(jnp.concatenate([wz[D + H:], wr[D + H:], wt[D + H:]], axis=1))
    b_all = jnp.concatenate([params["bz"], params["br"], params["bt"]], axis=1)
    wzh = bf16(wz[D:D + H])
    wrh = bf16(wr[D:D + H])
    wth = bf16(wt[D:D + H])
    xmean = params["xmean"].astype(jnp.float32)

    weight_args = [wg, bg, wx_all, wm_all, b_all, wzh, wrh, wth, xmean]

    def full_spec(a):
        return pl.BlockSpec(a.shape, lambda c, _n=a.ndim: (0,) * _n)

    in_specs = (
        [pl.BlockSpec((4, t_blk * B_pad, D), lambda c: (0, c, 0)),
         pl.BlockSpec((B_pad, H), lambda c: (0, 0))]
        + [full_spec(w) for w in weight_args])
    out_spec = pl.BlockSpec((t_blk * B_pad, H), lambda c: (c, 0))
    out_shape = jax.ShapeDtypeStruct((T_pad * B_pad, H), jnp.float32)

    kernel = _make_grud_kernel(t_blk, B_pad, D, H)

    h_seq = pl.pallas_call(
        kernel,
        out_shape=out_shape,
        grid_spec=pltpu.PrefetchScalarGridSpec(
            num_scalar_prefetch=0,
            grid=(nc,),
            in_specs=in_specs,
            out_specs=out_spec,
            scratch_shapes=(
                [pltpu.VMEM((t_blk * B_pad, H), jnp.float32) for _ in range(4)]
                + [pltpu.VMEM((B_pad, H), jnp.float32)]),
        ),
        compiler_params=pltpu.CompilerParams(
            dimension_semantics=("arbitrary",),
            vmem_limit_bytes=vmem_limit),
    )(seq, h0p, *weight_args)

    h_seq = h_seq.reshape(T_pad, B_pad, H)
    h_used = h_seq[:T, :B]          # (T, B, H) hidden states for real steps
    hidden = h_seq[T - 1, :B]       # (B, H) final hidden

    # fc_op head, hoisted out of the recurrence (default single-pass precision)
    z1 = jnp.dot(h_used, params["w1"]) + params["b1"]
    tr = _leaky_relu(jnp.dot(z1, params["w2"]) + params["b2"])   # (T, B, O)
    tr_out = jnp.transpose(tr, (1, 0, 2))                        # (B, T, O)
    outputs = tr_out[:, T - 1]                                   # fc_op(final hidden)

    # aux heads: dense heads on the final hidden state (glue, not hot path)
    aux_out = []
    for (wa1, ba1, wa2, ba2) in params["aux"]:
        a = jnp.dot(hidden, wa1) + ba1
        aux_out.append(_leaky_relu(jnp.dot(a, wa2) + ba2))

    return outputs, tr_out, aux_out, hidden


# ----------------------------------------------------------------------------
# Pure-JAX reference (mirrors the PyTorch forward exactly)
# ----------------------------------------------------------------------------
def grud_forward_ref(inputs, h0, params):
    inputs = inputs.astype(jnp.float32)
    B, C, T, D = inputs.shape
    h = h0

    def fc(hh):
        return _leaky_relu((hh @ params["w1"] + params["b1"]) @ params["w2"]
                           + params["b2"])

    tr = []
    for t in range(T):
        x = inputs[:, 0, t]
        m = inputs[:, 1, t]
        d = inputs[:, 2, t]
        xp = inputs[:, 3, t]
        gx = jnp.exp(-jnp.maximum(0.0, d @ params["wgx"] + params["bgx"]))
        gh = jnp.exp(-jnp.maximum(0.0, d @ params["wgh"] + params["bgh"]))
        x = m * x + (1 - m) * (gx * xp + (1 - gx) * params["xmean"])
        h = gh * h
        gate_in = jnp.concatenate([x, h, m], -1)
        z = jax.nn.sigmoid(gate_in @ params["wz"] + params["bz"])
        r = jax.nn.sigmoid(gate_in @ params["wr"] + params["br"])
        tilde_in = jnp.concatenate([x, r * h, m], -1)
        tilde = jnp.tanh(tilde_in @ params["wt"] + params["bt"])
        h = (1 - z) * h + z * tilde
        tr.append(fc(h))
    tr = jnp.stack(tr, axis=1)
    outputs = fc(h)
    aux_out = [_leaky_relu((h @ wa1 + ba1) @ wa2 + ba2)
               for (wa1, ba1, wa2, ba2) in params["aux"]]
    return outputs, tr, aux_out, h


# ----------------------------------------------------------------------------
# Deterministic parameter construction (shapes from GRUD.__init__, use_decay=True)
# ----------------------------------------------------------------------------
def init_params(key, D, H, O, aux_dims):
    H3 = H // 3
    Din = 2 * D + H  # input_dim + hidden_dim + mask_dim
    n_keys = 15 + 4 * len(aux_dims)
    keys = list(jax.random.split(key, n_keys))

    def w(k, shape, scale=0.1):
        return (scale * jax.random.normal(k, shape)).astype(jnp.float32)

    params = dict(
        wgx=w(keys[0], (D, D)),   bgx=w(keys[1], (1, D)),
        wgh=w(keys[2], (D, H)),   bgh=w(keys[3], (1, H)),
        wz=w(keys[4], (Din, H)),  bz=w(keys[5], (1, H)),
        wr=w(keys[6], (Din, H)),  br=w(keys[7], (1, H)),
        wt=w(keys[8], (Din, H)),  bt=w(keys[9], (1, H)),
        w1=w(keys[10], (H, H3)),  b1=w(keys[11], (1, H3)),
        w2=w(keys[12], (H3, O)),  b2=w(keys[13], (1, O)),
        xmean=w(keys[14], (1, D), scale=0.5),
    )
    aux = []
    k = 15
    for a in aux_dims:
        aux.append((w(keys[k], (H, H3)), w(keys[k + 1], (1, H3)),
                    w(keys[k + 2], (H3, a)), w(keys[k + 3], (1, a))))
        k += 4
    params["aux"] = aux
    return params


if __name__ == "__main__":
    B, D, H, O, T = 2, 8, 32, 4, 8
    aux_dims = [3]

    key = jax.random.PRNGKey(0)
    kp, kx, km, kd, kxp = jax.random.split(key, 5)
    params = init_params(kp, D, H, O, aux_dims)

    x_seq = jax.random.normal(kx, (B, T, D), jnp.float32)
    mask = (jax.random.uniform(km, (B, T, D)) > 0.5).astype(jnp.float32)
    delta = jax.random.uniform(kd, (B, T, D), dtype=jnp.float32)
    x_tm1 = jax.random.normal(kxp, (B, T, D), jnp.float32)
    inputs = jnp.stack([x_seq, mask, delta, x_tm1], axis=1)  # (B, 4, T, D)
    h0 = jnp.zeros((B, H), jnp.float32)  # GRUD.init_hidden

    outputs, tr_out, aux_out, hidden = grud_forward(inputs, h0, params)
    jax.block_until_ready((outputs, tr_out, hidden))

    # sanity check against the pure-JAX (f32 HIGHEST-precision) reference;
    # the kernel/head use single-pass bf16-operand MXU matmuls, hence 5e-3 tol.
    with jax.default_matmul_precision("highest"):
        ro, rt, ra, rh = grud_forward_ref(inputs, h0, params)

    assert outputs.shape == (B, O)
    assert tr_out.shape == (B, T, O)
    assert hidden.shape == (B, H)
    assert len(aux_out) == len(aux_dims) and aux_out[0].shape == (B, aux_dims[0])
    assert jnp.allclose(outputs, ro, rtol=5e-3, atol=5e-3)
    assert jnp.allclose(tr_out, rt, rtol=5e-3, atol=5e-3)
    assert jnp.allclose(hidden, rh, rtol=5e-3, atol=5e-3)

    print("KERNEL_OK")
</pallas_src>

<mosaic_0001>
module attributes {stable_mosaic.version = 11 : i64} {
  func.func @kernel(%arg0: i32, %arg1: memref<4x64x8xf32, #tpu.memory_space<vmem>>, %arg2: memref<8x32xf32, #tpu.memory_space<vmem>>, %arg3: memref<8x40xbf16, #tpu.memory_space<vmem>>, %arg4: memref<1x40xf32, #tpu.memory_space<vmem>>, %arg5: memref<8x96xbf16, #tpu.memory_space<vmem>>, %arg6: memref<8x96xbf16, #tpu.memory_space<vmem>>, %arg7: memref<1x96xf32, #tpu.memory_space<vmem>>, %arg8: memref<32x32xbf16, #tpu.memory_space<vmem>>, %arg9: memref<32x32xbf16, #tpu.memory_space<vmem>>, %arg10: memref<32x32xbf16, #tpu.memory_space<vmem>>, %arg11: memref<1x8xf32, #tpu.memory_space<vmem>>, %arg12: memref<64x32xf32, #tpu.memory_space<vmem>>, %arg13: memref<64x32xf32, #tpu.memory_space<vmem>>, %arg14: memref<64x32xf32, #tpu.memory_space<vmem>>, %arg15: memref<64x32xf32, #tpu.memory_space<vmem>>, %arg16: memref<64x32xf32, #tpu.memory_space<vmem>>, %arg17: memref<8x32xf32, #tpu.memory_space<vmem>>) attributes {dimension_semantics = [#tpu.dimension_semantics<arbitrary>], iteration_bounds = array<i64: 1>, scalar_prefetch = 0 : i64, scratch_operands = 5 : i64, tpu.core_type = #tpu.core_type<tc>, window_params = [{transform_indices = @transform_0, window_bounds = array<i64: 4, 64, 8>}, {pipeline_mode = #tpu.pipeline_mode<synchronous>, transform_indices = @transform_1, window_bounds = array<i64: 8, 32>}, {pipeline_mode = #tpu.pipeline_mode<synchronous>, transform_indices = @transform_2, window_bounds = array<i64: 8, 40>}, {pipeline_mode = #tpu.pipeline_mode<synchronous>, transform_indices = @transform_3, window_bounds = array<i64: 1, 40>}, {pipeline_mode = #tpu.pipeline_mode<synchronous>, transform_indices = @transform_4, window_bounds = array<i64: 8, 96>}, {pipeline_mode = #tpu.pipeline_mode<synchronous>, transform_indices = @transform_5, window_bounds = array<i64: 8, 96>}, {pipeline_mode = #tpu.pipeline_mode<synchronous>, transform_indices = @transform_6, window_bounds = array<i64: 1, 96>}, {pipeline_mode = #tpu.pipeline_mode<synchronous>, transform_indices = @transform_7, window_bounds = array<i64: 32, 32>}, {pipeline_mode = #tpu.pipeline_mode<synchronous>, transform_indices = @transform_8, window_bounds = array<i64: 32, 32>}, {pipeline_mode = #tpu.pipeline_mode<synchronous>, transform_indices = @transform_9, window_bounds = array<i64: 32, 32>}, {pipeline_mode = #tpu.pipeline_mode<synchronous>, transform_indices = @transform_10, window_bounds = array<i64: 1, 8>}, {transform_indices = @transform_11, window_bounds = array<i64: 64, 32>}]} {
    %c0_i32 = arith.constant 0 : i32
    %0 = arith.cmpi eq, %arg0, %c0_i32 : i32
    %1 = arith.extui %0 : i1 to i32
    %c0_i32_0 = arith.constant 0 : i32
    %2 = arith.cmpi ne, %1, %c0_i32_0 : i32
    scf.if %2 {
      %c0_142 = arith.constant 0 : index
      %c0_143 = arith.constant 0 : index
      %362 = vector.load %arg2[%c0_142, %c0_143] : memref<8x32xf32, #tpu.memory_space<vmem>>, vector<8x32xf32>
      %c0_144 = arith.constant 0 : index
      %c0_145 = arith.constant 0 : index
      %363 = vector.load %arg17[%c0_144, %c0_145] : memref<8x32xf32, #tpu.memory_space<vmem>>, vector<8x32xf32>
      tpu.vector_store %arg17[%c0_144, %c0_145], %362 {strides = array<i32>} : memref<8x32xf32, #tpu.memory_space<vmem>>, vector<8x32xf32>,
    } else {
    }
    %c0 = arith.constant 0 : index
    %c0_1 = arith.constant 0 : index
    %c0_2 = arith.constant 0 : index
    %3 = vector.load %arg1[%c0, %c0_1, %c0_2] : memref<4x64x8xf32, #tpu.memory_space<vmem>>, vector<1x64x8xf32>
    %4 = vector.shape_cast %3 : vector<1x64x8xf32> to vector<64x8xf32>
    %c1 = arith.constant 1 : index
    %c0_3 = arith.constant 0 : index
    %c0_4 = arith.constant 0 : index
    %5 = vector.load %arg1[%c1, %c0_3, %c0_4] : memref<4x64x8xf32, #tpu.memory_space<vmem>>, vector<1x64x8xf32>
    %6 = vector.shape_cast %5 : vector<1x64x8xf32> to vector<64x8xf32>
    %c2 = arith.constant 2 : index
    %c0_5 = arith.constant 0 : index
    %c0_6 = arith.constant 0 : index
    %7 = vector.load %arg1[%c2, %c0_5, %c0_6] : memref<4x64x8xf32, #tpu.memory_space<vmem>>, vector<1x64x8xf32>
    %8 = vector.shape_cast %7 : vector<1x64x8xf32> to vector<64x8xf32>
    %c3 = arith.constant 3 : index
    %c0_7 = arith.constant 0 : index
    %c0_8 = arith.constant 0 : index
    %9 = vector.load %arg1[%c3, %c0_7, %c0_8] : memref<4x64x8xf32, #tpu.memory_space<vmem>>, vector<1x64x8xf32>
    %10 = vector.shape_cast %9 : vector<1x64x8xf32> to vector<64x8xf32>
    %11 = arith.truncf %8 : vector<64x8xf32> to vector<64x8xbf16>
    %c0_9 = arith.constant 0 : index
    %c0_10 = arith.constant 0 : index
    %12 = vector.load %arg3[%c0_9, %c0_10] : memref<8x40xbf16, #tpu.memory_space<vmem>>, vector<8x40xbf16>
    %cst = arith.constant dense<0.000000e+00> : vector<64x40xf32>
    %13 = tpu.matmul %11, %12, %cst {dimension_numbers = #tpu.dot_dimension_numbers<[1], [0], [0], [1], [0, 0, 1, 1], [], []>} : vector<64x8xbf16>, vector<8x40xbf16>, vector<64x40xf32> -> vector<64x40xf32>
    %c0_11 = arith.constant 0 : index
    %c0_12 = arith.constant 0 : index
    %14 = vector.load %arg4[%c0_11, %c0_12] : memref<1x40xf32, #tpu.memory_space<vmem>>, vector<1x40xf32>
    %15 = vector.broadcast %14 : vector<1x40xf32> to vector<64x40xf32>
    %16 = arith.addf %13, %15 : vector<64x40xf32>
    %cst_13 = arith.constant 0.000000e+00 : f32
    %17 = vector.broadcast %cst_13 : f32 to vector<64x40xf32>
    %18 = arith.maximumf %17, %16 : vector<64x40xf32>
    %cst_14 = arith.constant 0.000000e+00 : f32
    %19 = vector.broadcast %cst_14 : f32 to vector<64x40xf32>
    %20 = arith.subf %19, %18 : vector<64x40xf32>
    %21 = math.exp %20 : vector<64x40xf32>
    %22 = vector.extract_strided_slice %21 {offsets = [0, 0], sizes = [64, 8], strides = [1, 1]} : vector<64x40xf32> to vector<64x8xf32>
    %23 = vector.extract_strided_slice %21 {offsets = [0, 8], sizes = [64, 32], strides = [1, 1]} : vector<64x40xf32> to vector<64x32xf32>
    %c0_15 = arith.constant 0 : index
    %c0_16 = arith.constant 0 : index
    %24 = vector.load %arg13[%c0_15, %c0_16] : memref<64x32xf32, #tpu.memory_space<vmem>>, vector<64x32xf32>
    tpu.vector_store %arg13[%c0_15, %c0_16], %23 {strides = array<i32>} : memref<64x32xf32, #tpu.memory_space<vmem>>, vector<64x32xf32>,
    %25 = arith.mulf %6, %4 : vector<64x8xf32>
    %cst_17 = arith.constant 1.000000e+00 : f32
    %26 = vector.broadcast %cst_17 : f32 to vector<64x8xf32>
    %27 = arith.subf %26, %6 : vector<64x8xf32>
    %28 = arith.mulf %22, %10 : vector<64x8xf32>
    %cst_18 = arith.constant 1.000000e+00 : f32
    %29 = vector.broadcast %cst_18 : f32 to vector<64x8xf32>
    %30 = arith.subf %29, %22 : vector<64x8xf32>
    %c0_19 = arith.constant 0 : index
    %c0_20 = arith.constant 0 : index
    %31 = vector.load %arg11[%c0_19, %c0_20] : memref<1x8xf32, #tpu.memory_space<vmem>>, vector<1x8xf32>
    %32 = vector.broadcast %31 : vector<1x8xf32> to vector<64x8xf32>
    %33 = arith.mulf %30, %32 : vector<64x8xf32>
    %34 = arith.addf %28, %33 : vector<64x8xf32>
    %35 = arith.mulf %27, %34 : vector<64x8xf32>
    %36 = arith.addf %25, %35 : vector<64x8xf32>
    %37 = arith.truncf %36 : vector<64x8xf32> to vector<64x8xbf16>
    %c0_21 = arith.constant 0 : index
    %c0_22 = arith.constant 0 : index
    %38 = vector.load %arg5[%c0_21, %c0_22] : memref<8x96xbf16, #tpu.memory_space<vmem>>, vector<8x96xbf16>
    %cst_23 = arith.constant dense<0.000000e+00> : vector<64x96xf32>
    %39 = tpu.matmul %37, %38, %cst_23 {dimension_numbers = #tpu.dot_dimension_numbers<[1], [0], [0], [1], [0, 0, 1, 1], [], []>} : vector<64x8xbf16>, vector<8x96xbf16>, vector<64x96xf32> -> vector<64x96xf32>
    %40 = arith.truncf %6 : vector<64x8xf32> to vector<64x8xbf16>
    %c0_24 = arith.constant 0 : index
    %c0_25 = arith.constant 0 : index
    %41 = vector.load %arg6[%c0_24, %c0_25] : memref<8x96xbf16, #tpu.memory_space<vmem>>, vector<8x96xbf16>
    %cst_26 = arith.constant dense<0.000000e+00> : vector<64x96xf32>
    %42 = tpu.matmul %40, %41, %cst_26 {dimension_numbers = #tpu.dot_dimension_numbers<[1], [0], [0], [1], [0, 0, 1, 1], [], []>} : vector<64x8xbf16>, vector<8x96xbf16>, vector<64x96xf32> -> vector<64x96xf32>
    %43 = arith.addf %39, %42 : vector<64x96xf32>
    %c0_27 = arith.constant 0 : index
    %c0_28 = arith.constant 0 : index
    %44 = vector.load %arg7[%c0_27, %c0_28] : memref<1x96xf32, #tpu.memory_space<vmem>>, vector<1x96xf32>
    %45 = vector.broadcast %44 : vector<1x96xf32> to vector<64x96xf32>
    %46 = arith.addf %43, %45 : vector<64x96xf32>
    %47 = vector.extract_strided_slice %46 {offsets = [0, 0], sizes = [64, 32], strides = [1, 1]} : vector<64x96xf32> to vector<64x32xf32>
    %c0_29 = arith.constant 0 : index
    %c0_30 = arith.constant 0 : index
    %48 = vector.load %arg14[%c0_29, %c0_30] : memref<64x32xf32, #tpu.memory_space<vmem>>, vector<64x32xf32>
    tpu.vector_store %arg14[%c0_29, %c0_30], %47 {strides = array<i32>} : memref<64x32xf32, #tpu.memory_space<vmem>>, vector<64x32xf32>,
    %49 = vector.extract_strided_slice %46 {offsets = [0, 32], sizes = [64, 32], strides = [1, 1]} : vector<64x96xf32> to vector<64x32xf32>
    %c0_31 = arith.constant 0 : index
    %c0_32 = arith.constant 0 : index
    %50 = vector.load %arg15[%c0_31, %c0_32] : memref<64x32xf32, #tpu.memory_space<vmem>>, vector<64x32xf32>
    tpu.vector_store %arg15[%c0_31, %c0_32], %49 {strides = array<i32>} : memref<64x32xf32, #tpu.memory_space<vmem>>, vector<64x32xf32>,
    %51 = vector.extract_strided_slice %46 {offsets = [0, 64], sizes = [64, 32], strides = [1, 1]} : vector<64x96xf32> to vector<64x32xf32>
    %c0_33 = arith.constant 0 : index
    %c0_34 = arith.constant 0 : index
    %52 = vector.load %arg16[%c0_33, %c0_34] : memref<64x32xf32, #tpu.memory_space<vmem>>, vector<64x32xf32>
    tpu.vector_store %arg16[%c0_33, %c0_34], %51 {strides = array<i32>} : memref<64x32xf32, #tpu.memory_space<vmem>>, vector<64x32xf32>,
    %c0_35 = arith.constant 0 : index
    %c0_36 = arith.constant 0 : index
    %53 = vector.load %arg8[%c0_35, %c0_36] : memref<32x32xbf16, #tpu.memory_space<vmem>>, vector<32x32xbf16>
    %c0_37 = arith.constant 0 : index
    %c0_38 = arith.constant 0 : index
    %54 = vector.load %arg9[%c0_37, %c0_38] : memref<32x32xbf16, #tpu.memory_space<vmem>>, vector<32x32xbf16>
    %c0_39 = arith.constant 0 : index
    %c0_40 = arith.constant 0 : index
    %55 = vector.load %arg10[%c0_39, %c0_40] : memref<32x32xbf16, #tpu.memory_space<vmem>>, vector<32x32xbf16>
    %c0_41 = arith.constant 0 : index
    %c0_42 = arith.constant 0 : index
    %56 = vector.load %arg17[%c0_41, %c0_42] : memref<8x32xf32, #tpu.memory_space<vmem>>, vector<8x32xf32>
    %c0_i32_43 = arith.constant 0 : i32
    %c8_i32 = arith.constant 8 : i32
    %57 = arith.muli %c0_i32_43, %c8_i32 : i32
    %58 = tpu.assume_multiple %57, 8 : i32
    %59 = arith.index_cast %58 : i32 to index
    %c0_44 = arith.constant 0 : index
    %60 = vector.load %arg13[%59, %c0_44] : memref<64x32xf32, #tpu.memory_space<vmem>>, vector<8x32xf32>
    %61 = arith.mulf %60, %56 : vector<8x32xf32>
    %62 = arith.truncf %61 : vector<8x32xf32> to vector<8x32xbf16>
    %63 = arith.index_cast %58 : i32 to index
    %c0_45 = arith.constant 0 : index
    %64 = vector.load %arg14[%63, %c0_45] : memref<64x32xf32, #tpu.memory_space<vmem>>, vector<8x32xf32>
    %cst_46 = arith.constant dense<0.000000e+00> : vector<8x32xf32>
    %65 = tpu.matmul %62, %53, %cst_46 {dimension_numbers = #tpu.dot_dimension_numbers<[1], [0], [0], [1], [0, 0, 1, 1], [], []>} : vector<8x32xbf16>, vector<32x32xbf16>, vector<8x32xf32> -> vector<8x32xf32>
    %66 = arith.addf %64, %65 : vector<8x32xf32>
    %67 = arith.negf %66 : vector<8x32xf32>
    %68 = math.exp %67 : vector<8x32xf32>
    %cst_47 = arith.constant 1.000000e+00 : f32
    %69 = vector.broadcast %cst_47 : f32 to vector<8x32xf32>
    %70 = arith.addf %69, %68 : vector<8x32xf32>
    %71 = arith.divf %69, %70 : vector<8x32xf32>
    %72 = arith.index_cast %58 : i32 to index
    %c0_48 = arith.constant 0 : index
    %73 = vector.load %arg15[%72, %c0_48] : memref<64x32xf32, #tpu.memory_space<vmem>>, vector<8x32xf32>
    %cst_49 = arith.constant dense<0.000000e+00> : vector<8x32xf32>
    %74 = tpu.matmul %62, %54, %cst_49 {dimension_numbers = #tpu.dot_dimension_numbers<[1], [0], [0], [1], [0, 0, 1, 1], [], []>} : vector<8x32xbf16>, vector<32x32xbf16>, vector<8x32xf32> -> vector<8x32xf32>
    %75 = arith.addf %73, %74 : vector<8x32xf32>
    %76 = arith.negf %75 : vector<8x32xf32>
    %77 = math.exp %76 : vector<8x32xf32>
    %cst_50 = arith.constant 1.000000e+00 : f32
    %78 = vector.broadcast %cst_50 : f32 to vector<8x32xf32>
    %79 = arith.addf %78, %77 : vector<8x32xf32>
    %80 = arith.divf %78, %79 : vector<8x32xf32>
    %81 = arith.index_cast %58 : i32 to index
    %c0_51 = arith.constant 0 : index
    %82 = vector.load %arg16[%81, %c0_51] : memref<64x32xf32, #tpu.memory_space<vmem>>, vector<8x32xf32>
    %83 = arith.mulf %80, %61 : vector<8x32xf32>
    %84 = arith.truncf %83 : vector<8x32xf32> to vector<8x32xbf16>
    %cst_52 = arith.constant dense<0.000000e+00> : vector<8x32xf32>
    %85 = tpu.matmul %84, %55, %cst_52 {dimension_numbers = #tpu.dot_dimension_numbers<[1], [0], [0], [1], [0, 0, 1, 1], [], []>} : vector<8x32xbf16>, vector<32x32xbf16>, vector<8x32xf32> -> vector<8x32xf32>
    %86 = arith.addf %82, %85 : vector<8x32xf32>
    %87 = math.tanh %86 : vector<8x32xf32>
    %cst_53 = arith.constant 1.000000e+00 : f32
    %88 = vector.broadcast %cst_53 : f32 to vector<8x32xf32>
    %89 = arith.subf %88, %71 : vector<8x32xf32>
    %90 = arith.mulf %89, %61 : vector<8x32xf32>
    %91 = arith.mulf %71, %87 : vector<8x32xf32>
    %92 = arith.addf %90, %91 : vector<8x32xf32>
    %93 = arith.index_cast %58 : i32 to index
    %c0_54 = arith.constant 0 : index
    %94 = vector.load %arg12[%93, %c0_54] : memref<64x32xf32, #tpu.memory_space<vmem>>, vector<8x32xf32>
    tpu.vector_store %arg12[%93, %c0_54], %92 {strides = array<i32>} : memref<64x32xf32, #tpu.memory_space<vmem>>, vector<8x32xf32>,
    %c1_i32 = arith.constant 1 : i32
    %c8_i32_55 = arith.constant 8 : i32
    %95 = arith.muli %c1_i32, %c8_i32_55 : i32
    %96 = tpu.assume_multiple %95, 8 : i32
    %97 = arith.index_cast %96 : i32 to index
    %c0_56 = arith.constant 0 : index
    %98 = vector.load %arg13[%97, %c0_56] : memref<64x32xf32, #tpu.memory_space<vmem>>, vector<8x32xf32>
    %99 = arith.mulf %98, %92 : vector<8x32xf32>
    %100 = arith.truncf %99 : vector<8x32xf32> to vector<8x32xbf16>
    %101 = arith.index_cast %96 : i32 to index
    %c0_57 = arith.constant 0 : index
    %102 = vector.load %arg14[%101, %c0_57] : memref<64x32xf32, #tpu.memory_space<vmem>>, vector<8x32xf32>
    %cst_58 = arith.constant dense<0.000000e+00> : vector<8x32xf32>
    %103 = tpu.matmul %100, %53, %cst_58 {dimension_numbers = #tpu.dot_dimension_numbers<[1], [0], [0], [1], [0, 0, 1, 1], [], []>} : vector<8x32xbf16>, vector<32x32xbf16>, vector<8x32xf32> -> vector<8x32xf32>
    %104 = arith.addf %102, %103 : vector<8x32xf32>
    %105 = arith.negf %104 : vector<8x32xf32>
    %106 = math.exp %105 : vector<8x32xf32>
    %cst_59 = arith.constant 1.000000e+00 : f32
    %107 = vector.broadcast %cst_59 : f32 to vector<8x32xf32>
    %108 = arith.addf %107, %106 : vector<8x32xf32>
    %109 = arith.divf %107, %108 : vector<8x32xf32>
    %110 = arith.index_cast %96 : i32 to index
    %c0_60 = arith.constant 0 : index
    %111 = vector.load %arg15[%110, %c0_60] : memref<64x32xf32, #tpu.memory_space<vmem>>, vector<8x32xf32>
    %cst_61 = arith.constant dense<0.000000e+00> : vector<8x32xf32>
    %112 = tpu.matmul %100, %54, %cst_61 {dimension_numbers = #tpu.dot_dimension_numbers<[1], [0], [0], [1], [0, 0, 1, 1], [], []>} : vector<8x32xbf16>, vector<32x32xbf16>, vector<8x32xf32> -> vector<8x32xf32>
    %113 = arith.addf %111, %112 : vector<8x32xf32>
    %114 = arith.negf %113 : vector<8x32xf32>
    %115 = math.exp %114 : vector<8x32xf32>
    %cst_62 = arith.constant 1.000000e+00 : f32
    %116 = vector.broadcast %cst_62 : f32 to vector<8x32xf32>
    %117 = arith.addf %116, %115 : vector<8x32xf32>
    %118 = arith.divf %116, %117 : vector<8x32xf32>
    %119 = arith.index_cast %96 : i32 to index
    %c0_63 = arith.constant 0 : index
    %120 = vector.load %arg16[%119, %c0_63] : memref<64x32xf32, #tpu.memory_space<vmem>>, vector<8x32xf32>
    %121 = arith.mulf %118, %99 : vector<8x32xf32>
    %122 = arith.truncf %121 : vector<8x32xf32> to vector<8x32xbf16>
    %cst_64 = arith.constant dense<0.000000e+00> : vector<8x32xf32>
    %123 = tpu.matmul %122, %55, %cst_64 {dimension_numbers = #tpu.dot_dimension_numbers<[1], [0], [0], [1], [0, 0, 1, 1], [], []>} : vector<8x32xbf16>, vector<32x32xbf16>, vector<8x32xf32> -> vector<8x32xf32>
    %124 = arith.addf %120, %123 : vector<8x32xf32>
    %125 = math.tanh %124 : vector<8x32xf32>
    %cst_65 = arith.constant 1.000000e+00 : f32
    %126 = vector.broadcast %cst_65 : f32 to vector<8x32xf32>
    %127 = arith.subf %126, %109 : vector<8x32xf32>
    %128 = arith.mulf %127, %99 : vector<8x32xf32>
    %129 = arith.mulf %109, %125 : vector<8x32xf32>
    %130 = arith.addf %128, %129 : vector<8x32xf32>
    %131 = arith.index_cast %96 : i32 to index
    %c0_66 = arith.constant 0 : index
    %132 = vector.load %arg12[%131, %c0_66] : memref<64x32xf32, #tpu.memory_space<vmem>>, vector<8x32xf32>
    tpu.vector_store %arg12[%131, %c0_66], %130 {strides = array<i32>} : memref<64x32xf32, #tpu.memory_space<vmem>>, vector<8x32xf32>,
    %c2_i32 = arith.constant 2 : i32
    %c8_i32_67 = arith.constant 8 : i32
    %133 = arith.muli %c2_i32, %c8_i32_67 : i32
    %134 = tpu.assume_multiple %133, 8 : i32
    %135 = arith.index_cast %134 : i32 to index
    %c0_68 = arith.constant 0 : index
    %136 = vector.load %arg13[%135, %c0_68] : memref<64x32xf32, #tpu.memory_space<vmem>>, vector<8x32xf32>
    %137 = arith.mulf %136, %130 : vector<8x32xf32>
    %138 = arith.truncf %137 : vector<8x32xf32> to vector<8x32xbf16>
    %139 = arith.index_cast %134 : i32 to index
    %c0_69 = arith.constant 0 : index
    %140 = vector.load %arg14[%139, %c0_69] : memref<64x32xf32, #tpu.memory_space<vmem>>, vector<8x32xf32>
    %cst_70 = arith.constant dense<0.000000e+00> : vector<8x32xf32>
    %141 = tpu.matmul %138, %53, %cst_70 {dimension_numbers = #tpu.dot_dimension_numbers<[1], [0], [0], [1], [0, 0, 1, 1], [], []>} : vector<8x32xbf16>, vector<32x32xbf16>, vector<8x32xf32> -> vector<8x32xf32>
    %142 = arith.addf %140, %141 : vector<8x32xf32>
    %143 = arith.negf %142 : vector<8x32xf32>
    %144 = math.exp %143 : vector<8x32xf32>
    %cst_71 = arith.constant 1.000000e+00 : f32
    %145 = vector.broadcast %cst_71 : f32 to vector<8x32xf32>
    %146 = arith.addf %145, %144 : vector<8x32xf32>
    %147 = arith.divf %145, %146 : vector<8x32xf32>
    %148 = arith.index_cast %134 : i32 to index
    %c0_72 = arith.constant 0 : index
    %149 = vector.load %arg15[%148, %c0_72] : memref<64x32xf32, #tpu.memory_space<vmem>>, vector<8x32xf32>
    %cst_73 = arith.constant dense<0.000000e+00> : vector<8x32xf32>
    %150 = tpu.matmul %138, %54, %cst_73 {dimension_numbers = #tpu.dot_dimension_numbers<[1], [0], [0], [1], [0, 0, 1, 1], [], []>} : vector<8x32xbf16>, vector<32x32xbf16>, vector<8x32xf32> -> vector<8x32xf32>
    %151 = arith.addf %149, %150 : vector<8x32xf32>
    %152 = arith.negf %151 : vector<8x32xf32>
    %153 = math.exp %152 : vector<8x32xf32>
    %cst_74 = arith.constant 1.000000e+00 : f32
    %154 = vector.broadcast %cst_74 : f32 to vector<8x32xf32>
    %155 = arith.addf %154, %153 : vector<8x32xf32>
    %156 = arith.divf %154, %155 : vector<8x32xf32>
    %157 = arith.index_cast %134 : i32 to index
    %c0_75 = arith.constant 0 : index
    %158 = vector.load %arg16[%157, %c0_75] : memref<64x32xf32, #tpu.memory_space<vmem>>, vector<8x32xf32>
    %159 = arith.mulf %156, %137 : vector<8x32xf32>
    %160 = arith.truncf %159 : vector<8x32xf32> to vector<8x32xbf16>
    %cst_76 = arith.constant dense<0.000000e+00> : vector<8x32xf32>
    %161 = tpu.matmul %160, %55, %cst_76 {dimension_numbers = #tpu.dot_dimension_numbers<[1], [0], [0], [1], [0, 0, 1, 1], [], []>} : vector<8x32xbf16>, vector<32x32xbf16>, vector<8x32xf32> -> vector<8x32xf32>
    %162 = arith.addf %158, %161 : vector<8x32xf32>
    %163 = math.tanh %162 : vector<8x32xf32>
    %cst_77 = arith.constant 1.000000e+00 : f32
    %164 = vector.broadcast %cst_77 : f32 to vector<8x32xf32>
    %165 = arith.subf %164, %147 : vector<8x32xf32>
    %166 = arith.mulf %165, %137 : vector<8x32xf32>
    %167 = arith.mulf %147, %163 : vector<8x32xf32>
    %168 = arith.addf %166, %167 : vector<8x32xf32>
    %169 = arith.index_cast %134 : i32 to index
    %c0_78 = arith.constant 0 : index
    %170 = vector.load %arg12[%169, %c0_78] : memref<64x32xf32, #tpu.memory_space<vmem>>, vector<8x32xf32>
    tpu.vector_store %arg12[%169, %c0_78], %168 {strides = array<i32>} : memref<64x32xf32, #tpu.memory_space<vmem>>, vector<8x32xf32>,
    %c3_i32 = arith.constant 3 : i32
    %c8_i32_79 = arith.constant 8 : i32
    %171 = arith.muli %c3_i32, %c8_i32_79 : i32
    %172 = tpu.assume_multiple %171, 8 : i32
    %173 = arith.index_cast %172 : i32 to index
    %c0_80 = arith.constant 0 : index
    %174 = vector.load %arg13[%173, %c0_80] : memref<64x32xf32, #tpu.memory_space<vmem>>, vector<8x32xf32>
    %175 = arith.mulf %174, %168 : vector<8x32xf32>
    %176 = arith.truncf %175 : vector<8x32xf32> to vector<8x32xbf16>
    %177 = arith.index_cast %172 : i32 to index
    %c0_81 = arith.constant 0 : index
    %178 = vector.load %arg14[%177, %c0_81] : memref<64x32xf32, #tpu.memory_space<vmem>>, vector<8x32xf32>
    %cst_82 = arith.constant dense<0.000000e+00> : vector<8x32xf32>
    %179 = tpu.matmul %176, %53, %cst_82 {dimension_numbers = #tpu.dot_dimension_numbers<[1], [0], [0], [1], [0, 0, 1, 1], [], []>} : vector<8x32xbf16>, vector<32x32xbf16>, vector<8x32xf32> -> vector<8x32xf32>
    %180 = arith.addf %178, %179 : vector<8x32xf32>
    %181 = arith.negf %180 : vector<8x32xf32>
    %182 = math.exp %181 : vector<8x32xf32>
    %cst_83 = arith.constant 1.000000e+00 : f32
    %183 = vector.broadcast %cst_83 : f32 to vector<8x32xf32>
    %184 = arith.addf %183, %182 : vector<8x32xf32>
    %185 = arith.divf %183, %184 : vector<8x32xf32>
    %186 = arith.index_cast %172 : i32 to index
    %c0_84 = arith.constant 0 : index
    %187 = vector.load %arg15[%186, %c0_84] : memref<64x32xf32, #tpu.memory_space<vmem>>, vector<8x32xf32>
    %cst_85 = arith.constant dense<0.000000e+00> : vector<8x32xf32>
    %188 = tpu.matmul %176, %54, %cst_85 {dimension_numbers = #tpu.dot_dimension_numbers<[1], [0], [0], [1], [0, 0, 1, 1], [], []>} : vector<8x32xbf16>, vector<32x32xbf16>, vector<8x32xf32> -> vector<8x32xf32>
    %189 = arith.addf %187, %188 : vector<8x32xf32>
    %190 = arith.negf %189 : vector<8x32xf32>
    %191 = math.exp %190 : vector<8x32xf32>
    %cst_86 = arith.constant 1.000000e+00 : f32
    %192 = vector.broadcast %cst_86 : f32 to vector<8x32xf32>
    %193 = arith.addf %192, %191 : vector<8x32xf32>
    %194 = arith.divf %192, %193 : vector<8x32xf32>
    %195 = arith.index_cast %172 : i32 to index
    %c0_87 = arith.constant 0 : index
    %196 = vector.load %arg16[%195, %c0_87] : memref<64x32xf32, #tpu.memory_space<vmem>>, vector<8x32xf32>
    %197 = arith.mulf %194, %175 : vector<8x32xf32>
    %198 = arith.truncf %197 : vector<8x32xf32> to vector<8x32xbf16>
    %cst_88 = arith.constant dense<0.000000e+00> : vector<8x32xf32>
    %199 = tpu.matmul %198, %55, %cst_88 {dimension_numbers = #tpu.dot_dimension_numbers<[1], [0], [0], [1], [0, 0, 1, 1], [], []>} : vector<8x32xbf16>, vector<32x32xbf16>, vector<8x32xf32> -> vector<8x32xf32>
    %200 = arith.addf %196, %199 : vector<8x32xf32>
    %201 = math.tanh %200 : vector<8x32xf32>
    %cst_89 = arith.constant 1.000000e+00 : f32
    %202 = vector.broadcast %cst_89 : f32 to vector<8x32xf32>
    %203 = arith.subf %202, %185 : vector<8x32xf32>
    %204 = arith.mulf %203, %175 : vector<8x32xf32>
    %205 = arith.mulf %185, %201 : vector<8x32xf32>
    %206 = arith.addf %204, %205 : vector<8x32xf32>
    %207 = arith.index_cast %172 : i32 to index
    %c0_90 = arith.constant 0 : index
    %208 = vector.load %arg12[%207, %c0_90] : memref<64x32xf32, #tpu.memory_space<vmem>>, vector<8x32xf32>
    tpu.vector_store %arg12[%207, %c0_90], %206 {strides = array<i32>} : memref<64x32xf32, #tpu.memory_space<vmem>>, vector<8x32xf32>,
    %c4_i32 = arith.constant 4 : i32
    %c8_i32_91 = arith.constant 8 : i32
    %209 = arith.muli %c4_i32, %c8_i32_91 : i32
    %210 = tpu.assume_multiple %209, 8 : i32
    %211 = arith.index_cast %210 : i32 to index
    %c0_92 = arith.constant 0 : index
    %212 = vector.load %arg13[%211, %c0_92] : memref<64x32xf32, #tpu.memory_space<vmem>>, vector<8x32xf32>
    %213 = arith.mulf %212, %206 : vector<8x32xf32>
    %214 = arith.truncf %213 : vector<8x32xf32> to vector<8x32xbf16>
    %215 = arith.index_cast %210 : i32 to index
    %c0_93 = arith.constant 0 : index
    %216 = vector.load %arg14[%215, %c0_93] : memref<64x32xf32, #tpu.memory_space<vmem>>, vector<8x32xf32>
    %cst_94 = arith.constant dense<0.000000e+00> : vector<8x32xf32>
    %217 = tpu.matmul %214, %53, %cst_94 {dimension_numbers = #tpu.dot_dimension_numbers<[1], [0], [0], [1], [0, 0, 1, 1], [], []>} : vector<8x32xbf16>, vector<32x32xbf16>, vector<8x32xf32> -> vector<8x32xf32>
    %218 = arith.addf %216, %217 : vector<8x32xf32>
    %219 = arith.negf %218 : vector<8x32xf32>
    %220 = math.exp %219 : vector<8x32xf32>
    %cst_95 = arith.constant 1.000000e+00 : f32
    %221 = vector.broadcast %cst_95 : f32 to vector<8x32xf32>
    %222 = arith.addf %221, %220 : vector<8x32xf32>
    %223 = arith.divf %221, %222 : vector<8x32xf32>
    %224 = arith.index_cast %210 : i32 to index
    %c0_96 = arith.constant 0 : index
    %225 = vector.load %arg15[%224, %c0_96] : memref<64x32xf32, #tpu.memory_space<vmem>>, vector<8x32xf32>
    %cst_97 = arith.constant dense<0.000000e+00> : vector<8x32xf32>
    %226 = tpu.matmul %214, %54, %cst_97 {dimension_numbers = #tpu.dot_dimension_numbers<[1], [0], [0], [1], [0, 0, 1, 1], [], []>} : vector<8x32xbf16>, vector<32x32xbf16>, vector<8x32xf32> -> vector<8x32xf32>
    %227 = arith.addf %225, %226 : vector<8x32xf32>
    %228 = arith.negf %227 : vector<8x32xf32>
    %229 = math.exp %228 : vector<8x32xf32>
    %cst_98 = arith.constant 1.000000e+00 : f32
    %230 = vector.broadcast %cst_98 : f32 to vector<8x32xf32>
    %231 = arith.addf %230, %229 : vector<8x32xf32>
    %232 = arith.divf %230, %231 : vector<8x32xf32>
    %233 = arith.index_cast %210 : i32 to index
    %c0_99 = arith.constant 0 : index
    %234 = vector.load %arg16[%233, %c0_99] : memref<64x32xf32, #tpu.memory_space<vmem>>, vector<8x32xf32>
    %235 = arith.mulf %232, %213 : vector<8x32xf32>
    %236 = arith.truncf %235 : vector<8x32xf32> to vector<8x32xbf16>
    %cst_100 = arith.constant dense<0.000000e+00> : vector<8x32xf32>
    %237 = tpu.matmul %236, %55, %cst_100 {dimension_numbers = #tpu.dot_dimension_numbers<[1], [0], [0], [1], [0, 0, 1, 1], [], []>} : vector<8x32xbf16>, vector<32x32xbf16>, vector<8x32xf32> -> vector<8x32xf32>
    %238 = arith.addf %234, %237 : vector<8x32xf32>
    %239 = math.tanh %238 : vector<8x32xf32>
    %cst_101 = arith.constant 1.000000e+00 : f32
    %240 = vector.broadcast %cst_101 : f32 to vector<8x32xf32>
    %241 = arith.subf %240, %223 : vector<8x32xf32>
    %242 = arith.mulf %241, %213 : vector<8x32xf32>
    %243 = arith.mulf %223, %239 : vector<8x32xf32>
    %244 = arith.addf %242, %243 : vector<8x32xf32>
    %245 = arith.index_cast %210 : i32 to index
    %c0_102 = arith.constant 0 : index
    %246 = vector.load %arg12[%245, %c0_102] : memref<64x32xf32, #tpu.memory_space<vmem>>, vector<8x32xf32>
    tpu.vector_store %arg12[%245, %c0_102], %244 {strides = array<i32>} : memref<64x32xf32, #tpu.memory_space<vmem>>, vector<8x32xf32>,
    %c5_i32 = arith.constant 5 : i32
    %c8_i32_103 = arith.constant 8 : i32
    %247 = arith.muli %c5_i32, %c8_i32_103 : i32
    %248 = tpu.assume_multiple %247, 8 : i32
    %249 = arith.index_cast %248 : i32 to index
    %c0_104 = arith.constant 0 : index
    %250 = vector.load %arg13[%249, %c0_104] : memref<64x32xf32, #tpu.memory_space<vmem>>, vector<8x32xf32>
    %251 = arith.mulf %250, %244 : vector<8x32xf32>
    %252 = arith.truncf %251 : vector<8x32xf32> to vector<8x32xbf16>
    %253 = arith.index_cast %248 : i32 to index
    %c0_105 = arith.constant 0 : index
    %254 = vector.load %arg14[%253, %c0_105] : memref<64x32xf32, #tpu.memory_space<vmem>>, vector<8x32xf32>
    %cst_106 = arith.constant dense<0.000000e+00> : vector<8x32xf32>
    %255 = tpu.matmul %252, %53, %cst_106 {dimension_numbers = #tpu.dot_dimension_numbers<[1], [0], [0], [1], [0, 0, 1, 1], [], []>} : vector<8x32xbf16>, vector<32x32xbf16>, vector<8x32xf32> -> vector<8x32xf32>
    %256 = arith.addf %254, %255 : vector<8x32xf32>
    %257 = arith.negf %256 : vector<8x32xf32>
    %258 = math.exp %257 : vector<8x32xf32>
    %cst_107 = arith.constant 1.000000e+00 : f32
    %259 = vector.broadcast %cst_107 : f32 to vector<8x32xf32>
    %260 = arith.addf %259, %258 : vector<8x32xf32>
    %261 = arith.divf %259, %260 : vector<8x32xf32>
    %262 = arith.index_cast %248 : i32 to index
    %c0_108 = arith.constant 0 : index
    %263 = vector.load %arg15[%262, %c0_108] : memref<64x32xf32, #tpu.memory_space<vmem>>, vector<8x32xf32>
    %cst_109 = arith.constant dense<0.000000e+00> : vector<8x32xf32>
    %264 = tpu.matmul %252, %54, %cst_109 {dimension_numbers = #tpu.dot_dimension_numbers<[1], [0], [0], [1], [0, 0, 1, 1], [], []>} : vector<8x32xbf16>, vector<32x32xbf16>, vector<8x32xf32> -> vector<8x32xf32>
    %265 = arith.addf %263, %264 : vector<8x32xf32>
    %266 = arith.negf %265 : vector<8x32xf32>
    %267 = math.exp %266 : vector<8x32xf32>
    %cst_110 = arith.constant 1.000000e+00 : f32
    %268 = vector.broadcast %cst_110 : f32 to vector<8x32xf32>
    %269 = arith.addf %268, %267 : vector<8x32xf32>
    %270 = arith.divf %268, %269 : vector<8x32xf32>
    %271 = arith.index_cast %248 : i32 to index
    %c0_111 = arith.constant 0 : index
    %272 = vector.load %arg16[%271, %c0_111] : memref<64x32xf32, #tpu.memory_space<vmem>>, vector<8x32xf32>
    %273 = arith.mulf %270, %251 : vector<8x32xf32>
    %274 = arith.truncf %273 : vector<8x32xf32> to vector<8x32xbf16>
    %cst_112 = arith.constant dense<0.000000e+00> : vector<8x32xf32>
    %275 = tpu.matmul %274, %55, %cst_112 {dimension_numbers = #tpu.dot_dimension_numbers<[1], [0], [0], [1], [0, 0, 1, 1], [], []>} : vector<8x32xbf16>, vector<32x32xbf16>, vector<8x32xf32> -> vector<8x32xf32>
    %276 = arith.addf %272, %275 : vector<8x32xf32>
    %277 = math.tanh %276 : vector<8x32xf32>
    %cst_113 = arith.constant 1.000000e+00 : f32
    %278 = vector.broadcast %cst_113 : f32 to vector<8x32xf32>
    %279 = arith.subf %278, %261 : vector<8x32xf32>
    %280 = arith.mulf %279, %251 : vector<8x32xf32>
    %281 = arith.mulf %261, %277 : vector<8x32xf32>
    %282 = arith.addf %280, %281 : vector<8x32xf32>
    %283 = arith.index_cast %248 : i32 to index
    %c0_114 = arith.constant 0 : index
    %284 = vector.load %arg12[%283, %c0_114] : memref<64x32xf32, #tpu.memory_space<vmem>>, vector<8x32xf32>
    tpu.vector_store %arg12[%283, %c0_114], %282 {strides = array<i32>} : memref<64x32xf32, #tpu.memory_space<vmem>>, vector<8x32xf32>,
    %c6_i32 = arith.constant 6 : i32
    %c8_i32_115 = arith.constant 8 : i32
    %285 = arith.muli %c6_i32, %c8_i32_115 : i32
    %286 = tpu.assume_multiple %285, 8 : i32
    %287 = arith.index_cast %286 : i32 to index
    %c0_116 = arith.constant 0 : index
    %288 = vector.load %arg13[%287, %c0_116] : memref<64x32xf32, #tpu.memory_space<vmem>>, vector<8x32xf32>
    %289 = arith.mulf %288, %282 : vector<8x32xf32>
    %290 = arith.truncf %289 : vector<8x32xf32> to vector<8x32xbf16>
    %291 = arith.index_cast %286 : i32 to index
    %c0_117 = arith.constant 0 : index
    %292 = vector.load %arg14[%291, %c0_117] : memref<64x32xf32, #tpu.memory_space<vmem>>, vector<8x32xf32>
    %cst_118 = arith.constant dense<0.000000e+00> : vector<8x32xf32>
    %293 = tpu.matmul %290, %53, %cst_118 {dimension_numbers = #tpu.dot_dimension_numbers<[1], [0], [0], [1], [0, 0, 1, 1], [], []>} : vector<8x32xbf16>, vector<32x32xbf16>, vector<8x32xf32> -> vector<8x32xf32>
    %294 = arith.addf %292, %293 : vector<8x32xf32>
    %295 = arith.negf %294 : vector<8x32xf32>
    %296 = math.exp %295 : vector<8x32xf32>
    %cst_119 = arith.constant 1.000000e+00 : f32
    %297 = vector.broadcast %cst_119 : f32 to vector<8x32xf32>
    %298 = arith.addf %297, %296 : vector<8x32xf32>
    %299 = arith.divf %297, %298 : vector<8x32xf32>
    %300 = arith.index_cast %286 : i32 to index
    %c0_120 = arith.constant 0 : index
    %301 = vector.load %arg15[%300, %c0_120] : memref<64x32xf32, #tpu.memory_space<vmem>>, vector<8x32xf32>
    %cst_121 = arith.constant dense<0.000000e+00> : vector<8x32xf32>
    %302 = tpu.matmul %290, %54, %cst_121 {dimension_numbers = #tpu.dot_dimension_numbers<[1], [0], [0], [1], [0, 0, 1, 1], [], []>} : vector<8x32xbf16>, vector<32x32xbf16>, vector<8x32xf32> -> vector<8x32xf32>
    %303 = arith.addf %301, %302 : vector<8x32xf32>
    %304 = arith.negf %303 : vector<8x32xf32>
    %305 = math.exp %304 : vector<8x32xf32>
    %cst_122 = arith.constant 1.000000e+00 : f32
    %306 = vector.broadcast %cst_122 : f32 to vector<8x32xf32>
    %307 = arith.addf %306, %305 : vector<8x32xf32>
    %308 = arith.divf %306, %307 : vector<8x32xf32>
    %309 = arith.index_cast %286 : i32 to index
    %c0_123 = arith.constant 0 : index
    %310 = vector.load %arg16[%309, %c0_123] : memref<64x32xf32, #tpu.memory_space<vmem>>, vector<8x32xf32>
    %311 = arith.mulf %308, %289 : vector<8x32xf32>
    %312 = arith.truncf %311 : vector<8x32xf32> to vector<8x32xbf16>
    %cst_124 = arith.constant dense<0.000000e+00> : vector<8x32xf32>
    %313 = tpu.matmul %312, %55, %cst_124 {dimension_numbers = #tpu.dot_dimension_numbers<[1], [0], [0], [1], [0, 0, 1, 1], [], []>} : vector<8x32xbf16>, vector<32x32xbf16>, vector<8x32xf32> -> vector<8x32xf32>
    %314 = arith.addf %310, %313 : vector<8x32xf32>
    %315 = math.tanh %314 : vector<8x32xf32>
    %cst_125 = arith.constant 1.000000e+00 : f32
    %316 = vector.broadcast %cst_125 : f32 to vector<8x32xf32>
    %317 = arith.subf %316, %299 : vector<8x32xf32>
    %318 = arith.mulf %317, %289 : vector<8x32xf32>
    %319 = arith.mulf %299, %315 : vector<8x32xf32>
    %320 = arith.addf %318, %319 : vector<8x32xf32>
    %321 = arith.index_cast %286 : i32 to index
    %c0_126 = arith.constant 0 : index
    %322 = vector.load %arg12[%321, %c0_126] : memref<64x32xf32, #tpu.memory_space<vmem>>, vector<8x32xf32>
    tpu.vector_store %arg12[%321, %c0_126], %320 {strides = array<i32>} : memref<64x32xf32, #tpu.memory_space<vmem>>, vector<8x32xf32>,
    %c7_i32 = arith.constant 7 : i32
    %c8_i32_127 = arith.constant 8 : i32
    %323 = arith.muli %c7_i32, %c8_i32_127 : i32
    %324 = tpu.assume_multiple %323, 8 : i32
    %325 = arith.index_cast %324 : i32 to index
    %c0_128 = arith.constant 0 : index
    %326 = vector.load %arg13[%325, %c0_128] : memref<64x32xf32, #tpu.memory_space<vmem>>, vector<8x32xf32>
    %327 = arith.mulf %326, %320 : vector<8x32xf32>
    %328 = arith.truncf %327 : vector<8x32xf32> to vector<8x32xbf16>
    %329 = arith.index_cast %324 : i32 to index
    %c0_129 = arith.constant 0 : index
    %330 = vector.load %arg14[%329, %c0_129] : memref<64x32xf32, #tpu.memory_space<vmem>>, vector<8x32xf32>
    %cst_130 = arith.constant dense<0.000000e+00> : vector<8x32xf32>
    %331 = tpu.matmul %328, %53, %cst_130 {dimension_numbers = #tpu.dot_dimension_numbers<[1], [0], [0], [1], [0, 0, 1, 1], [], []>} : vector<8x32xbf16>, vector<32x32xbf16>, vector<8x32xf32> -> vector<8x32xf32>
    %332 = arith.addf %330, %331 : vector<8x32xf32>
    %333 = arith.negf %332 : vector<8x32xf32>
    %334 = math.exp %333 : vector<8x32xf32>
    %cst_131 = arith.constant 1.000000e+00 : f32
    %335 = vector.broadcast %cst_131 : f32 to vector<8x32xf32>
    %336 = arith.addf %335, %334 : vector<8x32xf32>
    %337 = arith.divf %335, %336 : vector<8x32xf32>
    %338 = arith.index_cast %324 : i32 to index
    %c0_132 = arith.constant 0 : index
    %339 = vector.load %arg15[%338, %c0_132] : memref<64x32xf32, #tpu.memory_space<vmem>>, vector<8x32xf32>
    %cst_133 = arith.constant dense<0.000000e+00> : vector<8x32xf32>
    %340 = tpu.matmul %328, %54, %cst_133 {dimension_numbers = #tpu.dot_dimension_numbers<[1], [0], [0], [1], [0, 0, 1, 1], [], []>} : vector<8x32xbf16>, vector<32x32xbf16>, vector<8x32xf32> -> vector<8x32xf32>
    %341 = arith.addf %339, %340 : vector<8x32xf32>
    %342 = arith.negf %341 : vector<8x32xf32>
    %343 = math.exp %342 : vector<8x32xf32>
    %cst_134 = arith.constant 1.000000e+00 : f32
    %344 = vector.broadcast %cst_134 : f32 to vector<8x32xf32>
    %345 = arith.addf %344, %343 : vector<8x32xf32>
    %346 = arith.divf %344, %345 : vector<8x32xf32>
    %347 = arith.index_cast %324 : i32 to index
    %c0_135 = arith.constant 0 : index
    %348 = vector.load %arg16[%347, %c0_135] : memref<64x32xf32, #tpu.memory_space<vmem>>, vector<8x32xf32>
    %349 = arith.mulf %346, %327 : vector<8x32xf32>
    %350 = arith.truncf %349 : vector<8x32xf32> to vector<8x32xbf16>
    %cst_136 = arith.constant dense<0.000000e+00> : vector<8x32xf32>
    %351 = tpu.matmul %350, %55, %cst_136 {dimension_numbers = #tpu.dot_dimension_numbers<[1], [0], [0], [1], [0, 0, 1, 1], [], []>} : vector<8x32xbf16>, vector<32x32xbf16>, vector<8x32xf32> -> vector<8x32xf32>
    %352 = arith.addf %348, %351 : vector<8x32xf32>
    %353 = math.tanh %352 : vector<8x32xf32>
    %cst_137 = arith.constant 1.000000e+00 : f32
    %354 = vector.broadcast %cst_137 : f32 to vector<8x32xf32>
    %355 = arith.subf %354, %337 : vector<8x32xf32>
    %356 = arith.mulf %355, %327 : vector<8x32xf32>
    %357 = arith.mulf %337, %353 : vector<8x32xf32>
    %358 = arith.addf %356, %357 : vector<8x32xf32>
    %359 = arith.index_cast %324 : i32 to index
    %c0_138 = arith.constant 0 : index
    %360 = vector.load %arg12[%359, %c0_138] : memref<64x32xf32, #tpu.memory_space<vmem>>, vector<8x32xf32>
    tpu.vector_store %arg12[%359, %c0_138], %358 {strides = array<i32>} : memref<64x32xf32, #tpu.memory_space<vmem>>, vector<8x32xf32>,
    %c8_i32_139 = arith.constant 8 : i32
    %c0_140 = arith.constant 0 : index
    %c0_141 = arith.constant 0 : index
    %361 = vector.load %arg17[%c0_140, %c0_141] : memref<8x32xf32, #tpu.memory_space<vmem>>, vector<8x32xf32>
    tpu.vector_store %arg17[%c0_140, %c0_141], %358 {strides = array<i32>} : memref<8x32xf32, #tpu.memory_space<vmem>>, vector<8x32xf32>,
    return
  }
  func.func @transform_0(%arg0: i32) -> (i32, i32, i32) {
    %c0_i32 = arith.constant 0 : i32
    %c0_i32_0 = arith.constant 0 : i32
    %c0_i32_1 = arith.constant 0 : i32
    return %c0_i32, %arg0, %c0_i32_0 : i32, i32, i32
  }
  func.func @transform_1(%arg0: i32) -> (i32, i32) {
    %c0_i32 = arith.constant 0 : i32
    %c0_i32_0 = arith.constant 0 : i32
    %c0_i32_1 = arith.constant 0 : i32
    return %c0_i32, %c0_i32_0 : i32, i32
  }
  func.func @transform_2(%arg0: i32) -> (i32, i32) {
    %c0_i32 = arith.constant 0 : i32
    %c0_i32_0 = arith.constant 0 : i32
    %c0_i32_1 = arith.constant 0 : i32
    return %c0_i32, %c0_i32_0 : i32, i32
  }
  func.func @transform_3(%arg0: i32) -> (i32, i32) {
    %c0_i32 = arith.constant 0 : i32
    %c0_i32_0 = arith.constant 0 : i32
    %c0_i32_1 = arith.constant 0 : i32
    return %c0_i32, %c0_i32_0 : i32, i32
  }
  func.func @transform_4(%arg0: i32) -> (i32, i32) {
    %c0_i32 = arith.constant 0 : i32
    %c0_i32_0 = arith.constant 0 : i32
    %c0_i32_1 = arith.constant 0 : i32
    return %c0_i32, %c0_i32_0 : i32, i32
  }
  func.func @transform_5(%arg0: i32) -> (i32, i32) {
    %c0_i32 = arith.constant 0 : i32
    %c0_i32_0 = arith.constant 0 : i32
    %c0_i32_1 = arith.constant 0 : i32
    return %c0_i32, %c0_i32_0 : i32, i32
  }
  func.func @transform_6(%arg0: i32) -> (i32, i32) {
    %c0_i32 = arith.constant 0 : i32
    %c0_i32_0 = arith.constant 0 : i32
    %c0_i32_1 = arith.constant 0 : i32
    return %c0_i32, %c0_i32_0 : i32, i32
  }
  func.func @transform_7(%arg0: i32) -> (i32, i32) {
    %c0_i32 = arith.constant 0 : i32
    %c0_i32_0 = arith.constant 0 : i32
    %c0_i32_1 = arith.constant 0 : i32
    return %c0_i32, %c0_i32_0 : i32, i32
  }
  func.func @transform_8(%arg0: i32) -> (i32, i32) {
    %c0_i32 = arith.constant 0 : i32
    %c0_i32_0 = arith.constant 0 : i32
    %c0_i32_1 = arith.constant 0 : i32
    return %c0_i32, %c0_i32_0 : i32, i32
  }
  func.func @transform_9(%arg0: i32) -> (i32, i32) {
    %c0_i32 = arith.constant 0 : i32
    %c0_i32_0 = arith.constant 0 : i32
    %c0_i32_1 = arith.constant 0 : i32
    return %c0_i32, %c0_i32_0 : i32, i32
  }
  func.func @transform_10(%arg0: i32) -> (i32, i32) {
    %c0_i32 = arith.constant 0 : i32
    %c0_i32_0 = arith.constant 0 : i32
    %c0_i32_1 = arith.constant 0 : i32
    return %c0_i32, %c0_i32_0 : i32, i32
  }
  func.func @transform_11(%arg0: i32) -> (i32, i32) {
    %c0_i32 = arith.constant 0 : i32
    %c0_i32_0 = arith.constant 0 : i32
    return %arg0, %c0_i32 : i32, i32
  }
}

</mosaic_0001>

<bundles_post_ra>
// kernel: tpu_custom_call.1
= control target key start
LH: loop header
LB: loop body
LE: loop exit
PB: predicated region body
PF: predicated region fallthrough
CT: control target
= control target key end

     0   :  { %vm103_vm0 = vcmask 1043456   ;;  %vm90_vm1 = vcmask 64512   ;;  %vm44_vm2 = vcmask 261120   ;;  %s1579_s30 = smov 96   ;;  %s2065_s2 = inlined_call_operand.vmem [shape: bf16[8,40], index: 2, kind: input, shape index: {}]   ;;  %s2066_s0 = inlined_call_operand.vmem [shape: f32[4,64,8], index: 0, kind: input, shape index: {}]   ;;  %s2067_s3 = inlined_call_operand.vmem [shape: f32[1,40], index: 3, kind: input, shape index: {}]   ;;  %s2068_s10 = inlined_call_operand.vmem [shape: f32[1,8], index: 10, kind: input, shape index: {}]   ;;  %s2069_s5 = inlined_call_operand.vmem [shape: bf16[8,96], index: 5, kind: input, shape index: {}]   ;;  %s2070_s4 = inlined_call_operand.vmem [shape: bf16[8,96], index: 4, kind: input, shape index: {}]   ;;  %s2071_s6 = inlined_call_operand.vmem [shape: f32[1,96], index: 6, kind: input, shape index: {}]   ;;  %s2072_s1 = inlined_call_operand.vmem [shape: f32[8,32], index: 1, kind: input, shape index: {}]   ;;  %s2073_s7 = inlined_call_operand.vmem [shape: bf16[32,32], index: 7, kind: input, shape index: {}]   ;;  %s2074_s8 = inlined_call_operand.vmem [shape: bf16[32,32], index: 8, kind: input, shape index: {}]   ;;  %s2075_s9 = inlined_call_operand.vmem [shape: bf16[32,32], index: 9, kind: input, shape index: {}]   ;;  %s2076_s11 = inlined_call_operand.vmem [shape: f32[64,32], index: 11, kind: output, shape index: {}]  }
   0x1   :  { %v85_v0 = vld [vmem:[%s2065_s2] sm:$0xf]  ;;  %v1365_v2 = vld [vmem:[%s2066_s0 + $0x88] sm:$0xff] }
   0x2   :  { %v1364_v1 = vld [vmem:[%s2066_s0 + $0x80] sm:$0xff]  ;;  %v105_v3 = vsel %vm103_vm0, %v85_v0, 0  ;;  %v1357_v10 = vld [vmem:[%s2066_s0 + $0x48] sm:$0xff] }
   0x3   :  { %v81_v4 = vpack.c.bf16 %v1365_v2, %v1364_v1  ;;  %114 = vmatpush.bf16.msra.mxu0 %v105_v3  ;;  %v286_v5 = vld [vmem:[%s2069_s5] sm:$0xf]  ;;  %v1373_v30 = vld [vmem:[%s2066_s0 + $0xc8] sm:$0xff]  ;;  %v218_v36 = vsub.f32 1.0, %v1357_v10  ;;  %s1578_s5 = smov 64  }
   0x4   :  { %v281_v6 = vld [vmem:[%s2070_s4] sm:$0xf]  ;;  %v300_v7 = vsel %vm103_vm0, %v286_v5, 0  ;;  %s1577_s4 = smov 120   ;;  %v47_v35 = vld [vmem:[%s2066_s0 + $0x8] sm:$0xff] }
   0x5   :  { %v344_v8 = vsel %vm103_vm0, %v281_v6, 0  ;;  %v1356_v9 = vld [vmem:[%s2066_s0 + $0x40] sm:$0xff]  ;;  %309 = vmatpush.bf16.msra.mxu1 %v300_v7  ;;  %v210_v40 = vmul.f32 %v1357_v10, %v47_v35  ;;  %v1704_v48 = vld [vmem:[%s2073_s7 + $0x8] sm:$0xff] }
   0x6   :  { %1380 = vmatmul.msk.bf16.vlgmr.msra.gmra.mxu0 %vm90_vm1, %v81_v4  ;;  %353 = vmatpush.bf16.msra.mxu2 %v344_v8  ;;  %v282_v11 = vpack.c.bf16 %v1357_v10, %v1356_v9  ;;  %v1669_v12 = vld [vmem:[%s2067_s3] ss:$0 sm:$0xff]  ;;  %v217_v31 = vsub.f32 1.0, %v1356_v9  ;;  %v1719_v50 = vld [vmem:[%s2074_s8 + $0x8] sm:$0xff] }
   0x7   :  { %v1677_v25 = vld [vmem:[%s2068_s10] ss:$0 sm:$0xff]  ;;  %505 = vmatpush.bf16.msra.mxu3 %v1704_v48  ;;  %666 = vmatpush.bf16.msrb.mxu0 %v1719_v50  ;;  %v1763_v8 = vld [vmem:[%s2075_s9 + $0x8] sm:$0xff] }
   0x8   :  { %1384 = vmatmul.msk.bf16.vlgmr.msra.gmra.mxu1 %vm90_vm1, %v282_v11  ;;  %v1372_v26 = vld [vmem:[%s2066_s0 + $0xc0] sm:$0xff] }
   0x9   :  { %v46_v34 = vld [vmem:[%s2066_s0] sm:$0xff]  ;;  %706 = vmatpush.bf16.msrb.mxu1 %v1763_v8 }
   0xa   :  { %v209_v39 = vmul.f32 %v1356_v9, %v46_v34  ;;  %v43_v47 = vld [vmem:[%s2072_s1] sm:$0xff]  ;;  %736 = vmatpush.bf16.msrb.mxu2 %v1704_v48 }
   0xb   :  { %45 = vst.msk [vmem:[#allocation6] sm:$0xff] %vm44_vm2, %v43_v47  ;;  %v1711_v49 = vld [vmem:[%s2073_s7] sm:$0xff] }
   0xc   :  { %506 = vmatpush.bf16.msra.mxu3 %v1711_v49  ;;  %v1725_v51 = vld [vmem:[%s2074_s8] sm:$0xff] }
   0xd   :  { %667 = vmatpush.bf16.msrb.mxu0 %v1725_v51  ;;  %v1742_v58 = vld [vmem:[%s2071_s6] ss:$0 sm:$0xff] }
   0xe   :  { %737 = vmatpush.bf16.msrb.mxu2 %v1711_v49  ;;  %v1769_v10 = vld [vmem:[%s2075_s9] sm:$0xff] }
   0xf   :  { %707 = vmatpush.bf16.msrb.mxu1 %v1769_v10 }
  0x10   :  { %551 = vmatpush.bf16.msrb.mxu3 %v1719_v50 }
  0x11   :  { %811 = vmatpush.bf16.msra.mxu0 %v1763_v8 }
  0x12   :  { %v479_v53 = vld [vmem:[#allocation6] sm:$0xff] }
  0x13   :  { %841 = vmatpush.bf16.msra.mxu1 %v1704_v48 }
  0x14   :  { %552 = vmatpush.bf16.msrb.mxu3 %v1725_v51 }
  0x15   :  { %812 = vmatpush.bf16.msra.mxu0 %v1769_v10 }
  0x17   :  { %842 = vmatpush.bf16.msra.mxu1 %v1711_v49 }
  0x83   :  { %v116_v13 = vpop.f32.mrf.mxu0 }
  0x84   :  { %v117_v14 = vadd.f32 %v1669_v12, %v116_v13 }
  0x85   :  { %v311_v57 = vpop.f32.mrf.mxu1 }
  0x86   :  { %v136_v15 = vmax.f32 %v117_v14, 0.0 }
  0x88   :  { %v144_v16 = vsub.f32 0.0, %v136_v15 }
  0x8a   :  { %v152_v17 = vmul.f32 1.442695, %v144_v16 }
  0x8b   :  { %v118_v18 = vpop.f32.mrf.mxu0 }
  0x8c   :  { %1475 = vpow2.f32 %v152_v17  ;;  %v119_v19 = vadd.f32 %v1669_v12, %v118_v18  ;;  %v1366_v17 = vld [vmem:[%s2066_s0 + $0x90] sm:$0xff]  ;;  %v1367_v18 = vld [vmem:[%s2066_s0 + $0x98] sm:$0xff] }
  0x8d   :  { %v313_v62 = vpop.f32.mrf.mxu1 }
  0x8e   :  { %v137_v20 = vmax.f32 %v119_v19, 0.0  ;;  %v82_v19 = vpack.c.bf16 %v1367_v18, %v1366_v17  ;;  %v1359_v17 = vld [vmem:[%s2066_s0 + $0x58] sm:$0xff]  ;;  %v1374_v18 = vld [vmem:[%s2066_s0 + $0xd0] sm:$0xff] }
  0x90   :  { %v145_v21 = vsub.f32 0.0, %v137_v20  ;;  %1381 = vmatmul.msk.bf16.gmra.mxu0 %vm90_vm1, %v82_v19 }
  0x92   :  { %v1476_v22 = vpop.eup %1475  ;;  %v154_v23 = vmul.f32 1.442695, %v145_v21 }
  0x93   :  { %176 = vrot.lane.b32.xlu0 %v1476_v22, %s1577_s4  ;;  %v233_v24 = vsub.f32 1.0, %v1476_v22  ;;  %v225_v28 = vmul.f32 %v1476_v22, %v1372_v26  ;;  %v1368_v22 = vld [vmem:[%s2066_s0 + $0xa0] sm:$0xff] }
  0x94   :  { %1477 = vpow2.f32 %v154_v23  ;;  %v1369_v23 = vld [vmem:[%s2066_s0 + $0xa8] sm:$0xff] }
  0x95   :  { %v245_v27 = vmul.f32 %v1677_v25, %v233_v24  ;;  %v83_v24 = vpack.c.bf16 %v1369_v23, %v1368_v22 }
  0x97   :  { %v253_v33 = vadd.f32 %v245_v27, %v225_v28 }
  0x99   :  { %v261_v42 = vmul.f32 %v253_v33, %v217_v31 }
  0x9a   :  { %v1683_v29 = vpop.eup %1477 }
  0x9b   :  { %v234_v32 = vsub.f32 1.0, %v1683_v29  ;;  %v226_v37 = vmul.f32 %v1683_v29, %v1373_v30  ;;  %v269_v44 = vadd.f32 %v261_v42, %v209_v39 }
  0x9d   :  { %v246_v38 = vmul.f32 %v1677_v25, %v234_v32 }
  0x9f   :  { %v254_v41 = vadd.f32 %v246_v38, %v226_v37  ;;  %v1370_v37 = vld [vmem:[%s2066_s0 + $0xb0] sm:$0xff]  ;;  %v1371_v38 = vld [vmem:[%s2066_s0 + $0xb8] sm:$0xff] }
  0xa0   :  { %1382 = vmatmul.msk.bf16.gmra.mxu0 %vm90_vm1, %v83_v24 }
  0xa1   :  { %v262_v43 = vmul.f32 %v254_v41, %v218_v36 }
  0xa3   :  { %v270_v45 = vadd.f32 %v262_v43, %v210_v40  ;;  %v84_v40 = vpack.c.bf16 %v1371_v38, %v1370_v37 }
  0xa5   :  { %v277_v46 = vpack.c.bf16 %v270_v45, %v269_v44 }
  0xa7   :  { %1388 = vmatmul.msk.bf16.vlgmr.msra.gmra.mxu2 %vm90_vm1, %v277_v46 }
  0xa8   :  { %876 = vmatpush.bf16.msra.mxu2 %v1719_v50 }
  0xac   :  { %877 = vmatpush.bf16.msra.mxu2 %v1725_v51 }
  0xb0   :  { %1383 = vmatmul.msk.bf16.gmra.mxu0 %vm90_vm1, %v84_v40 }
 0x105   :  { %v177_v52 = vpop.permute.xlu0 %176 }
 0x106   :  { %201 = vst.msk [vmem:[#allocation2] sm:$0xff] %vm44_vm2, %v177_v52 }
 0x10d   :  { %v480_v54 = vld [vmem:[#allocation2] sm:$0xff]  ;;  %v121_v52 = vpop.f32.mrf.mxu0 }
 0x10e   :  { %v1733_v55 = vmul.f32 %v480_v54, %v479_v53  ;;  %v122_v53 = vadd.f32 %v1669_v12, %v121_v52  ;;  %v220_v52 = vsub.f32 1.0, %v1359_v17 }
 0x110   :  { %v482_v56 = vpack.c.bf16 %v1733_v55, %v1733_v55 }
 0x112   :  { %1400 = vmatmul.msk.bf16.vlgmr.msra.gmra.mxu3 %vm44_vm2, %v482_v56 }
 0x113   :  { %602 = vmatpush.bf16.msra.mxu3 %v1763_v8 }
 0x117   :  { %603 = vmatpush.bf16.msra.mxu3 %v1769_v10 }
 0x122   :  { %1410 = vmatmul.msk.bf16.vlgmr.msrb.gmra.mxu3 %vm44_vm2, %v482_v56  ;;  %v138_v56 = vmax.f32 %v122_v53, 0.0 }
 0x123   :  { %631 = vmatpush.bf16.msrb.mxu3 %v1704_v48 }
 0x127   :  { %632 = vmatpush.bf16.msrb.mxu3 %v1711_v49 }
 0x12a   :  { %v355_v59 = vpop.f32.mrf.mxu2 }
 0x12b   :  { %v356_v60 = vadd.f32 %v355_v59, %v311_v57  ;;  %v146_v57 = vsub.f32 0.0, %v138_v56 }
 0x12d   :  { %v379_v61 = vadd.f32 %v1742_v58, %v356_v60  ;;  %v156_v60 = vmul.f32 1.442695, %v146_v57 }
 0x12f   :  { %387 = vst.msk [vmem:[#allocation3] sm:$0xff] %vm44_vm2, %v379_v61  ;;  %435 = vrot.lane.b32.xlu1 %v379_v61, %s1578_s5  ;;  %403 = vrot.lane.b32.xlu0 %v379_v61, %s1579_s30  ;;  %v123_v61 = vpop.f32.mrf.mxu0 }
 0x132   :  { %v357_v63 = vpop.f32.mrf.mxu2 }
 0x133   :  { %v358_v0 = vadd.f32 %v357_v63, %v313_v62  ;;  %v124_v62 = vadd.f32 %v1669_v12, %v123_v61  ;;  %v1360_v61 = vld [vmem:[%s2066_s0 + $0x60] sm:$0xff] }
 0x135   :  { %v380_v1 = vadd.f32 %v1742_v58, %v358_v0 }
 0x136   :  { %v483_v41 = vld [vmem:[#allocation3] sm:$0xff] }
 0x137   :  { %388 = vst.msk [vmem:[#allocation3 + $0x8] sm:$0xff] %vm44_vm2, %v380_v1  ;;  %405 = vrot.lane.b32.xlu2 %v380_v1, %s1579_s30  ;;  %178 = vrot.lane.b32.xlu1 %v1683_v29, %s1577_s4 }
 0x13f   :  { %437 = vrot.lane.b32.xlu2 %v380_v1, %s1578_s5  ;;  %v139_v1 = vmax.f32 %v124_v62, 0.0  ;;  %v1361_v62 = vld [vmem:[%s2066_s0 + $0x68] sm:$0xff] }
 0x191   :  { %v406_v2 = vpop.permute.xlu2 %405 }
 0x192   :  { %428 = vst.msk [vmem:[#allocation4 + $0x8] sm:$0xff] %vm44_vm2, %v406_v2 }
 0x195   :  { %v1755_v3 = vpop.f32.mrf.mxu3 }
 0x196   :  { %v512_v42 = vadd.f32 %v1755_v3, %v483_v41  ;;  %v1376_v3 = vld [vmem:[%s2066_s0 + $0xe0] sm:$0xff] }
 0x198   :  { %v1401_v43 = vmul.f32 -1.442695, %v512_v42 }
 0x199   :  { %v438_v4 = vpop.permute.xlu2 %437 }
 0x19a   :  { %460 = vst.msk [vmem:[#allocation5 + $0x8] sm:$0xff] %vm44_vm2, %v438_v4  ;;  %v147_v4 = vsub.f32 0.0, %v139_v1 }
 0x19d   :  { %v510_v5 = vpop.f32.mrf.mxu3 }
 0x1a1   :  { %v436_v6 = vpop.permute.xlu1 %435  ;;  %v404_v7 = vpop.permute.xlu0 %403 }
 0x1a2   :  { %459 = vst.msk [vmem:[#allocation5] sm:$0xff] %vm44_vm2, %v436_v6 }
 0x1a3   :  { %427 = vst.msk [vmem:[#allocation4] sm:$0xff] %vm44_vm2, %v404_v7 }
 0x1a5   :  { %v554_v9 = vpop.f32.mrf.mxu3 }
 0x1a9   :  { %v179_v11 = vpop.permute.xlu1 %178  ;;  %v578_v6 = vld [vmem:[#allocation5] sm:$0xff] }
 0x1aa   :  { %v532_v13 = vld [vmem:[#allocation4] sm:$0xff]  ;;  %202 = vst.msk [vmem:[#allocation2 + $0x8] sm:$0xff] %vm44_vm2, %v179_v11 }
 0x1ab   :  { %v558_v14 = vadd.f32 %v554_v9, %v532_v13 }
 0x1ad   :  { %v1411_v15 = vmul.f32 -1.442695, %v558_v14  ;;  %v556_v16 = vpop.f32.mrf.mxu3  ;;  %v158_v14 = vmul.f32 1.442695, %v147_v4  ;;  %v284_v4 = vpack.c.bf16 %v1361_v62, %v1360_v61 }
 0x1ae   :  { %v1358_v16 = vld [vmem:[%s2066_s0 + $0x50] sm:$0xff] }
 0x1af   :  { %1479 = vpow2.f32 %v1411_v15  ;;  %v126_v15 = vpop.f32.mrf.mxu0  ;;  %v283_v22 = vpack.c.bf16 %v1359_v17, %v1358_v16 }
 0x1b1   :  { %1385 = vmatmul.msk.bf16.gmra.mxu1 %vm90_vm1, %v283_v22 }
 0x1b5   :  { %v1480_v20 = vpop.eup %1479 }
 0x1b6   :  { %v562_v21 = vadd.f32 1.0, %v1480_v20 }
 0x1b8   :  { %1481 = vrcp.f32 %v562_v21  ;;  %v574_v29 = vand.u32 2147483648, %v562_v21  ;;  %v572_v31 = vand.u32 2147483647, %v562_v21  ;;  %vm568_vm4 = vweird.f32 %v562_v21 }
 0x1b9   :  { %1483 = vpow2.f32 %v1401_v43 }
 0x1ba   :  { %v575_v33 = vor.u32 1.1754944e-38, %v574_v29  ;;  %vm573_vm6 = vcmp.eq.f32.partialorder %v572_v31, 8.507059e+37 }
 0x1be   :  { %v1482_v26 = vpop.eup %1481 }
 0x1bf   :  { %v564_v27 = vmul.f32 %v1482_v26, %v562_v21  ;;  %vm569_vm3 = vweird.f32 %v1482_v26  ;;  %v1484_v44 = vpop.eup %1483  ;;  %v127_v21 = vadd.f32 %v1669_v12, %v126_v15 }
 0x1c0   :  { %vm570_vm5 = vmor %vm568_vm4, %vm569_vm3  ;;  %v516_v45 = vadd.f32 1.0, %v1484_v44  ;;  %v49_v44 = vld [vmem:[%s2066_s0 + $0x18] sm:$0xff] }
 0x1c1   :  { %v565_v28 = vsub.f32 1.0, %v564_v27  ;;  %v140_v23 = vmax.f32 %v127_v21, 0.0  ;;  %v212_v57 = vmul.f32 %v1359_v17, %v49_v44  ;;  %1386 = vmatmul.msk.bf16.gmra.mxu1 %vm90_vm1, %v284_v4  ;;  %v1377_v17 = vld [vmem:[%s2066_s0 + $0xe8] sm:$0xff] }
 0x1c2   :  { %1485 = vrcp.f32 %v516_v45  ;;  %v528_v0 = vand.u32 2147483648, %v516_v45  ;;  %vm522_vm8 = vweird.f32 %v516_v45  ;;  %v526_v2 = vand.u32 2147483647, %v516_v45 }
 0x1c3   :  { %v566_v30 = vmul.f32 %v1482_v26, %v565_v28  ;;  %1487 = vpow2.f32 %v156_v60  ;;  %v148_v28 = vsub.f32 0.0, %v140_v23 }
 0x1c4   :  { %v529_v11 = vor.u32 1.1754944e-38, %v528_v0  ;;  %vm527_vm10 = vcmp.eq.f32.partialorder %v526_v2, 8.507059e+37 }
 0x1c5   :  { %v567_v32 = vadd.f32 %v1482_v26, %v566_v30  ;;  %v1375_v30 = vld [vmem:[%s2066_s0 + $0xd8] sm:$0xff] }
 0x1c7   :  { %v571_v34 = vsel %vm570_vm5, %v1482_v26, %v567_v32  ;;  %v160_v32 = vmul.f32 1.442695, %v148_v28  ;;  %v51_v28 = vld [vmem:[%s2066_s0 + $0x28] sm:$0xff] }
 0x1c8   :  { %v576_v35 = vsel %vm573_vm6, %v575_v33, %v571_v34  ;;  %v1486_v46 = vpop.eup %1485  ;;  %v48_v33 = vld [vmem:[%s2066_s0 + $0x10] sm:$0xff]  ;;  %v219_v34 = vsub.f32 1.0, %v1358_v16 }
 0x1c9   :  { %v579_v36 = vmul.f32 %v576_v35, %v1733_v55  ;;  %v518_v47 = vmul.f32 %v1486_v46, %v516_v45  ;;  %vm523_vm7 = vweird.f32 %v1486_v46  ;;  %v1488_v9 = vpop.eup %1487  ;;  %v211_v45 = vmul.f32 %v1358_v16, %v48_v33 }
 0x1ca   :  { %vm1809_vm9 = vmor %vm522_vm8, %vm523_vm7  ;;  %180 = vrot.lane.b32.xlu0 %v1488_v9, %s1577_s4  ;;  %v235_v19 = vsub.f32 1.0, %v1488_v9  ;;  %v227_v24 = vmul.f32 %v1488_v9, %v1374_v18  ;;  %v50_v18 = vld [vmem:[%s2066_s0 + $0x20] sm:$0xff] }
 0x1cb   :  { %v580_v39 = vpack.c.bf16 %v579_v36, %v579_v36  ;;  %v519_v54 = vsub.f32 1.0, %v518_v47 }
 0x1cc   :  { %v247_v26 = vmul.f32 %v1677_v25, %v235_v19  ;;  %v221_v19 = vsub.f32 1.0, %v1360_v61 }
 0x1cd   :  { %1420 = vmatmul.msk.bf16.vlgmr.msra.gmra.mxu3 %vm44_vm2, %v580_v39  ;;  %v520_v59 = vmul.f32 %v1486_v46, %v519_v54  ;;  %v128_v39 = vpop.f32.mrf.mxu0 }
 0x1ce   :  { %771 = vmatpush.bf16.msra.mxu3 %v1719_v50  ;;  %v255_v35 = vadd.f32 %v247_v26, %v227_v24  ;;  %v129_v40 = vadd.f32 %v1669_v12, %v128_v39 }
 0x1cf   :  { %v521_v63 = vadd.f32 %v1486_v46, %v520_v59 }
 0x1d0   :  { %v141_v47 = vmax.f32 %v129_v40, 0.0  ;;  %v263_v53 = vmul.f32 %v255_v35, %v219_v34  ;;  %v214_v34 = vmul.f32 %v1361_v62, %v51_v28 }
 0x1d1   :  { %v525_v5 = vsel %vm1809_vm9, %v1486_v46, %v521_v63  ;;  %v617_v46 = vld [vmem:[#allocation2 + $0x8] sm:$0xff] }
 0x1d2   :  { %772 = vmatpush.bf16.msra.mxu3 %v1725_v51  ;;  %v530_v20 = vsel %vm527_vm10, %v529_v11, %v525_v5  ;;  %v149_v56 = vsub.f32 0.0, %v141_v47  ;;  %v271_v2 = vadd.f32 %v263_v53, %v211_v45  ;;  %v1378_v45 = vld [vmem:[%s2066_s0 + $0xf0] sm:$0xff] }
 0x1d3   :  { %v611_v27 = vsub.f32 1.0, %v530_v20 }
 0x1d4   :  { %v162_v0 = vmul.f32 1.442695, %v149_v56  ;;  %v1362_v56 = vld [vmem:[%s2066_s0 + $0x70] sm:$0xff] }
 0x1d5   :  { %v612_v37 = vmul.f32 %v611_v27, %v1733_v55  ;;  %v131_v5 = vpop.f32.mrf.mxu0 }
 0x1dd   :  { %v133_v23 = vpop.f32.mrf.mxu0 }
 0x1de   :  { %v134_v27 = vadd.f32 %v1669_v12, %v133_v23 }
 0x1e0   :  { %v143_v33 = vmax.f32 %v134_v27, 0.0 }
 0x250   :  { %v605_v7 = vpop.f32.mrf.mxu3 }
 0x251   :  { %v609_v13 = vadd.f32 %v605_v7, %v578_v6  ;;  %v132_v7 = vadd.f32 %v1669_v12, %v131_v5 }
 0x253   :  { %1489 = vtanh.f32 %v609_v13 }
 0x254   :  { %1491 = vpow2.f32 %v158_v14  ;;  %v142_v14 = vmax.f32 %v132_v7, 0.0 }
 0x255   :  { %1493 = vpow2.f32 %v160_v32 }
 0x256   :  { %1495 = vpow2.f32 %v162_v0  ;;  %v150_v16 = vsub.f32 0.0, %v142_v14 }
 0x258   :  { %v607_v29 = vpop.f32.mrf.mxu3  ;;  %v164_v22 = vmul.f32 1.442695, %v150_v16  ;;  %v316_v16 = vpop.f32.mrf.mxu1 }
 0x259   :  { %v1490_v31 = vpop.eup %1489  ;;  %v213_v29 = vmul.f32 %v1360_v61, %v50_v18 }
 0x25a   :  { %v1492_v36 = vpop.eup %1491  ;;  %v613_v38 = vmul.f32 %v1490_v31, %v530_v20  ;;  %1497 = vpow2.f32 %v164_v22 }
 0x25b   :  { %182 = vrot.lane.b32.xlu0 %v1492_v36, %s1577_s4  ;;  %v228_v41 = vmul.f32 %v1492_v36, %v1375_v30  ;;  %v236_v42 = vsub.f32 1.0, %v1492_v36  ;;  %v1494_v63 = vpop.eup %1493  ;;  %v222_v30 = vsub.f32 1.0, %v1361_v62  ;;  %v151_v36 = vsub.f32 0.0, %v143_v33 }
 0x25c   :  { %v614_v43 = vadd.f32 %v613_v38, %v612_v37  ;;  %v237_v6 = vsub.f32 1.0, %v1494_v63  ;;  %v229_v11 = vmul.f32 %v1494_v63, %v1376_v3  ;;  %v1496_v21 = vpop.eup %1495 }
 0x25d   :  { %v248_v55 = vmul.f32 %v1677_v25, %v236_v42  ;;  %v230_v24 = vmul.f32 %v1496_v21, %v1377_v17  ;;  %v238_v26 = vsub.f32 1.0, %v1496_v21  ;;  %v166_v39 = vmul.f32 1.442695, %v151_v36 }
 0x25e   :  { %615 = vst.msk [vmem:[%s2076_s11] sm:$0xff] %vm44_vm2, %v614_v43  ;;  %v1845_v54 = vmul.f32 %v617_v46, %v614_v43  ;;  %v249_v13 = vmul.f32 %v1677_v25, %v237_v6  ;;  %v1379_v46 = vld [vmem:[%s2066_s0 + $0xf8] sm:$0xff] }
 0x25f   :  { %v256_v59 = vadd.f32 %v248_v55, %v228_v41  ;;  %v250_v31 = vmul.f32 %v1677_v25, %v238_v26  ;;  %1499 = vpow2.f32 %v166_v39 }
 0x260   :  { %v619_v60 = vpack.c.bf16 %v1845_v54, %v1845_v54  ;;  %v257_v20 = vadd.f32 %v249_v13, %v229_v11  ;;  %v1498_v12 = vpop.eup %1497 }
 0x261   :  { %v264_v1 = vmul.f32 %v256_v59, %v220_v52  ;;  %v258_v35 = vadd.f32 %v250_v31, %v230_v24  ;;  %v239_v43 = vsub.f32 1.0, %v1498_v12  ;;  %v231_v47 = vmul.f32 %v1498_v12, %v1378_v45  ;;  %v318_v24 = vpop.f32.mrf.mxu1 }
 0x262   :  { %1421 = vmatmul.msk.bf16.vlgmr.msrb.gmra.mxu3 %vm44_vm2, %v619_v60  ;;  %1423 = vmatmul.msk.bf16.vlgmr.msrb.gmra.mxu0 %vm44_vm2, %v619_v60  ;;  %v265_v32 = vmul.f32 %v257_v20, %v221_v19  ;;  %v223_v59 = vsub.f32 1.0, %v1362_v56 }
 0x263   :  { %v272_v9 = vadd.f32 %v264_v1, %v212_v57  ;;  %184 = vrot.lane.b32.xlu0 %v1494_v63, %s1577_s4  ;;  %916 = vmatpush.bf16.msrb.mxu3 %v1763_v8  ;;  %v266_v37 = vmul.f32 %v258_v35, %v222_v30  ;;  %v251_v55 = vmul.f32 %v1677_v25, %v239_v43  ;;  %v1363_v57 = vld [vmem:[%s2066_s0 + $0x78] sm:$0xff]  ;;  %v52_v63 = vld [vmem:[%s2066_s0 + $0x30] sm:$0xff] }
 0x264   :  { %946 = vmatpush.bf16.msrb.mxu0 %v1704_v48  ;;  %v273_v38 = vadd.f32 %v265_v32, %v213_v29  ;;  %v224_v60 = vsub.f32 1.0, %v1363_v57  ;;  %v215_v0 = vmul.f32 %v1362_v56, %v52_v63  ;;  %v285_v7 = vpack.c.bf16 %v1363_v57, %v1362_v56 }
 0x265   :  { %v278_v15 = vpack.c.bf16 %v272_v9, %v271_v2  ;;  %v274_v40 = vadd.f32 %v266_v37, %v214_v34  ;;  %v1500_v42 = vpop.eup %1499  ;;  %v259_v61 = vadd.f32 %v251_v55, %v231_v47  ;;  %v659_v9 = vld [vmem:[#allocation4 + $0x8] sm:$0xff] }
 0x266   :  { %v240_v44 = vsub.f32 1.0, %v1500_v42  ;;  %v232_v52 = vmul.f32 %v1500_v42, %v1379_v46  ;;  %1387 = vmatmul.msk.bf16.gmra.mxu1 %vm90_vm1, %v285_v7 }
 0x267   :  { %1389 = vmatmul.msk.bf16.gmra.mxu2 %vm90_vm1, %v278_v15  ;;  %917 = vmatpush.bf16.msrb.mxu3 %v1769_v10  ;;  %v279_v41 = vpack.c.bf16 %v274_v40, %v273_v38  ;;  %v267_v2 = vmul.f32 %v259_v61, %v223_v59  ;;  %v181_v15 = vpop.permute.xlu0 %180 }
 0x268   :  { %947 = vmatpush.bf16.msrb.mxu0 %v1711_v49  ;;  %v252_v53 = vmul.f32 %v1677_v25, %v240_v44  ;;  %v53_v25 = vld [vmem:[%s2066_s0 + $0x38] sm:$0xff]  ;;  %203 = vst.msk [vmem:[#allocation2 + $0x10] sm:$0xff] %vm44_vm2, %v181_v15 }
 0x269   :  { %v216_v1 = vmul.f32 %v1363_v57, %v53_v25  ;;  %v275_v4 = vadd.f32 %v267_v2, %v215_v0  ;;  %v321_v35 = vpop.f32.mrf.mxu1 }
 0x26a   :  { %v260_v62 = vadd.f32 %v252_v53, %v232_v52 }
 0x26b   :  { %186 = vrot.lane.b32.xlu0 %v1496_v21, %s1577_s4 }
 0x26c   :  { %v268_v3 = vmul.f32 %v260_v62, %v224_v60 }
 0x26e   :  { %v276_v5 = vadd.f32 %v268_v3, %v216_v1  ;;  %v621_v3 = vld [vmem:[#allocation3 + $0x8] sm:$0xff] }
 0x270   :  { %v280_v6 = vpack.c.bf16 %v276_v5, %v275_v4 }
 0x271   :  { %v323_v52 = vpop.f32.mrf.mxu1 }
 0x273   :  { %188 = vrot.lane.b32.xlu0 %v1498_v12, %s1577_s4 }
 0x277   :  { %1390 = vmatmul.msk.bf16.gmra.mxu2 %vm90_vm1, %v279_v41 }
 0x27b   :  { %190 = vrot.lane.b32.xlu0 %v1500_v42, %s1577_s4 }
 0x287   :  { %1391 = vmatmul.msk.bf16.gmra.mxu2 %vm90_vm1, %v280_v6 }
 0x2cd   :  { %v183_v20 = vpop.permute.xlu0 %182 }
 0x2ce   :  { %204 = vst.msk [vmem:[#allocation2 + $0x18] sm:$0xff] %vm44_vm2, %v183_v20 }
 0x2d5   :  { %v185_v28 = vpop.permute.xlu0 %184 }
 0x2d6   :  { %205 = vst.msk [vmem:[#allocation2 + $0x20] sm:$0xff] %vm44_vm2, %v185_v28 }
 0x2dd   :  { %v187_v12 = vpop.permute.xlu0 %186 }
 0x2de   :  { %206 = vst.msk [vmem:[#allocation2 + $0x28] sm:$0xff] %vm44_vm2, %v187_v12 }
 0x2df   :  { %v669_v11 = vpop.f32.mrf.mxu0 }
 0x2e0   :  { %v673_v13 = vadd.f32 %v669_v11, %v659_v9 }
 0x2e2   :  { %v1424_v14 = vmul.f32 -1.442695, %v673_v13 }
 0x2e3   :  { %v326_v60 = vpop.f32.mrf.mxu1 }
 0x2e4   :  { %1501 = vpow2.f32 %v1424_v14 }
 0x2e5   :  { %v1907_v17 = vpop.f32.mrf.mxu3  ;;  %v189_v55 = vpop.permute.xlu0 %188 }
 0x2e6   :  { %207 = vst.msk [vmem:[#allocation2 + $0x30] sm:$0xff] %vm44_vm2, %v189_v55  ;;  %v638_v4 = vadd.f32 %v1907_v17, %v621_v3 }
 0x2e7   :  { %v671_v18 = vpop.f32.mrf.mxu0 }
 0x2e8   :  { %v1422_v5 = vmul.f32 -1.442695, %v638_v4 }
 0x2ea   :  { %v1502_v19 = vpop.eup %1501  ;;  %v360_v21 = vpop.f32.mrf.mxu2 }
 0x2eb   :  { %v677_v22 = vadd.f32 1.0, %v1502_v19  ;;  %v361_v23 = vadd.f32 %v360_v21, %v316_v16  ;;  %v328_v25 = vpop.f32.mrf.mxu1  ;;  %v694_v21 = vld [vmem:[#allocation5 + $0x8] sm:$0xff] }
 0x2ed   :  { %1503 = vrcp.f32 %v677_v22  ;;  %v636_v26 = vpop.f32.mrf.mxu3  ;;  %v381_v27 = vadd.f32 %v1742_v58, %v361_v23  ;;  %v689_v36 = vand.u32 2147483648, %v677_v22  ;;  %v687_v38 = vand.u32 2147483647, %v677_v22  ;;  %v191_v59 = vpop.permute.xlu0 %190 }
 0x2ee   :  { %vm683_vm12 = vweird.f32 %v677_v22  ;;  %208 = vst.msk [vmem:[#allocation2 + $0x38] sm:$0xff] %vm44_vm2, %v191_v59  ;;  %1505 = vpow2.f32 %v1422_v5 }
 0x2ef   :  { %389 = vst.msk [vmem:[#allocation3 + $0x10] sm:$0xff] %vm44_vm2, %v381_v27  ;;  %439 = vrot.lane.b32.xlu2 %v381_v27, %s1578_s5  ;;  %407 = vrot.lane.b32.xlu1 %v381_v27, %s1579_s30  ;;  %v690_v41 = vor.u32 1.1754944e-38, %v689_v36  ;;  %vm688_vm14 = vcmp.eq.f32.partialorder %v687_v38, 8.507059e+37  ;;  %v722_v36 = vld [vmem:[#allocation2 + $0x10] sm:$0xff] }
 0x2f2   :  { %v362_v29 = vpop.f32.mrf.mxu2 }
 0x2f3   :  { %v1504_v30 = vpop.eup %1503  ;;  %v363_v31 = vadd.f32 %v362_v29, %v318_v24 }
 0x2f4   :  { %v679_v32 = vmul.f32 %v1504_v30, %v677_v22  ;;  %vm684_vm11 = vweird.f32 %v1504_v30  ;;  %v1506_v6 = vpop.eup %1505 }
 0x2f5   :  { %v382_v33 = vadd.f32 %v1742_v58, %v363_v31  ;;  %vm685_vm13 = vmor %vm683_vm12, %vm684_vm11  ;;  %v642_v7 = vadd.f32 1.0, %v1506_v6 }
 0x2f6   :  { %v680_v34 = vsub.f32 1.0, %v679_v32  ;;  %v726_v5 = vld [vmem:[#allocation3 + $0x10] sm:$0xff] }
 0x2f7   :  { %390 = vst.msk [vmem:[#allocation3 + $0x18] sm:$0xff] %vm44_vm2, %v382_v33  ;;  %441 = vrot.lane.b32.xlu2 %v382_v33, %s1578_s5  ;;  %409 = vrot.lane.b32.xlu1 %v382_v33, %s1579_s30  ;;  %1507 = vrcp.f32 %v642_v7  ;;  %v654_v18 = vand.u32 2147483648, %v642_v7  ;;  %vm648_vm0 = vweird.f32 %v642_v7  ;;  %v652_v19 = vand.u32 2147483647, %v642_v7 }
 0x2f8   :  { %v681_v37 = vmul.f32 %v1504_v30, %v680_v34 }
 0x2f9   :  { %v655_v23 = vor.u32 1.1754944e-38, %v654_v18  ;;  %vm653_vm3 = vcmp.eq.f32.partialorder %v652_v19, 8.507059e+37 }
 0x2fa   :  { %v682_v39 = vadd.f32 %v1504_v30, %v681_v37  ;;  %v365_v40 = vpop.f32.mrf.mxu2 }
 0x2fb   :  { %v366_v42 = vadd.f32 %v365_v40, %v321_v35 }
 0x2fc   :  { %v686_v43 = vsel %vm685_vm13, %v1504_v30, %v682_v39 }
 0x2fd   :  { %v691_v44 = vsel %vm688_vm14, %v690_v41, %v686_v43  ;;  %v383_v45 = vadd.f32 %v1742_v58, %v366_v42  ;;  %v1508_v9 = vpop.eup %1507 }
 0x2fe   :  { %v695_v46 = vmul.f32 %v691_v44, %v1845_v54  ;;  %v644_v11 = vmul.f32 %v1508_v9, %v642_v7  ;;  %vm649_vm15 = vweird.f32 %v1508_v9 }
 0x2ff   :  { %391 = vst.msk [vmem:[#allocation3 + $0x20] sm:$0xff] %vm44_vm2, %v383_v45  ;;  %443 = vrot.lane.b32.xlu2 %v383_v45, %s1578_s5  ;;  %411 = vrot.lane.b32.xlu1 %v383_v45, %s1579_s30  ;;  %vm650_vm1 = vmor %vm648_vm0, %vm649_vm15 }
 0x300   :  { %v696_v47 = vpack.c.bf16 %v695_v46, %v695_v46  ;;  %v645_v14 = vsub.f32 1.0, %v644_v11 }
 0x302   :  { %1425 = vmatmul.msk.bf16.vlgmr.msrb.gmra.mxu1 %vm44_vm2, %v696_v47  ;;  %v367_v53 = vpop.f32.mrf.mxu2  ;;  %v646_v15 = vmul.f32 %v1508_v9, %v645_v14 }
 0x303   :  { %v368_v56 = vadd.f32 %v367_v53, %v323_v52  ;;  %981 = vmatpush.bf16.msrb.mxu1 %v1719_v50 }
 0x304   :  { %v647_v17 = vadd.f32 %v1508_v9, %v646_v15 }
 0x305   :  { %v384_v57 = vadd.f32 %v1742_v58, %v368_v56 }
 0x306   :  { %v651_v20 = vsel %vm650_vm1, %v1508_v9, %v647_v17 }
 0x307   :  { %392 = vst.msk [vmem:[#allocation3 + $0x28] sm:$0xff] %vm44_vm2, %v384_v57  ;;  %982 = vmatpush.bf16.msrb.mxu1 %v1725_v51  ;;  %445 = vrot.lane.b32.xlu2 %v384_v57, %s1578_s5  ;;  %v656_v27 = vsel %vm653_vm3, %v655_v23, %v651_v20 }
 0x308   :  { %413 = vrot.lane.b32.xlu1 %v384_v57, %s1579_s30  ;;  %v715_v29 = vsub.f32 1.0, %v656_v27 }
 0x30a   :  { %v370_v61 = vpop.f32.mrf.mxu2  ;;  %v716_v32 = vmul.f32 %v715_v29, %v1845_v54 }
 0x30b   :  { %v371_v62 = vadd.f32 %v370_v61, %v326_v60 }
 0x30d   :  { %v385_v63 = vadd.f32 %v1742_v58, %v371_v62 }
 0x30f   :  { %393 = vst.msk [vmem:[#allocation3 + $0x30] sm:$0xff] %vm44_vm2, %v385_v63  ;;  %447 = vrot.lane.b32.xlu2 %v385_v63, %s1578_s5 }
 0x310   :  { %415 = vrot.lane.b32.xlu1 %v385_v63, %s1579_s30 }
 0x312   :  { %v372_v0 = vpop.f32.mrf.mxu2 }
 0x313   :  { %v373_v1 = vadd.f32 %v372_v0, %v328_v25 }
 0x315   :  { %v386_v2 = vadd.f32 %v1742_v58, %v373_v1 }
 0x317   :  { %394 = vst.msk [vmem:[#allocation3 + $0x38] sm:$0xff] %vm44_vm2, %v386_v2  ;;  %449 = vrot.lane.b32.xlu2 %v386_v2, %s1578_s5 }
 0x318   :  { %417 = vrot.lane.b32.xlu1 %v386_v2, %s1579_s30 }
 0x349   :  { %v440_v13 = vpop.permute.xlu2 %439 }
 0x34a   :  { %461 = vst.msk [vmem:[#allocation5 + $0x10] sm:$0xff] %vm44_vm2, %v440_v13 }
 0x351   :  { %v442_v16 = vpop.permute.xlu2 %441  ;;  %v799_v19 = vld [vmem:[#allocation5 + $0x10] sm:$0xff] }
 0x352   :  { %462 = vst.msk [vmem:[#allocation5 + $0x18] sm:$0xff] %vm44_vm2, %v442_v16 }
 0x359   :  { %v444_v26 = vpop.permute.xlu2 %443 }
 0x35a   :  { %463 = vst.msk [vmem:[#allocation5 + $0x20] sm:$0xff] %vm44_vm2, %v444_v26 }
 0x361   :  { %v408_v58 = vpop.permute.xlu1 %407  ;;  %v446_v34 = vpop.permute.xlu2 %445 }
 0x362   :  { %429 = vst.msk [vmem:[#allocation4 + $0x10] sm:$0xff] %vm44_vm2, %v408_v58 }
 0x363   :  { %464 = vst.msk [vmem:[#allocation5 + $0x28] sm:$0xff] %vm44_vm2, %v446_v34 }
 0x369   :  { %v410_v28 = vpop.permute.xlu1 %409  ;;  %v448_v12 = vpop.permute.xlu2 %447  ;;  %v764_v44 = vld [vmem:[#allocation4 + $0x10] sm:$0xff] }
 0x36a   :  { %430 = vst.msk [vmem:[#allocation4 + $0x18] sm:$0xff] %vm44_vm2, %v410_v28 }
 0x36b   :  { %465 = vst.msk [vmem:[#allocation5 + $0x30] sm:$0xff] %vm44_vm2, %v448_v12 }
 0x371   :  { %v412_v37 = vpop.permute.xlu1 %411  ;;  %v450_v40 = vpop.permute.xlu2 %449  ;;  %v869_v34 = vld [vmem:[#allocation4 + $0x18] sm:$0xff] }
 0x372   :  { %431 = vst.msk [vmem:[#allocation4 + $0x20] sm:$0xff] %vm44_vm2, %v412_v37 }
 0x373   :  { %466 = vst.msk [vmem:[#allocation5 + $0x38] sm:$0xff] %vm44_vm2, %v450_v40 }
 0x37a   :  { %v414_v54 = vpop.permute.xlu1 %413 }
 0x37b   :  { %432 = vst.msk [vmem:[#allocation4 + $0x28] sm:$0xff] %vm44_vm2, %v414_v54 }
 0x37f   :  { %v709_v22 = vpop.f32.mrf.mxu1 }
 0x380   :  { %v713_v24 = vadd.f32 %v709_v22, %v694_v21 }
 0x382   :  { %1509 = vtanh.f32 %v713_v24  ;;  %v416_v41 = vpop.permute.xlu1 %415 }
 0x383   :  { %433 = vst.msk [vmem:[#allocation4 + $0x30] sm:$0xff] %vm44_vm2, %v416_v41 }
 0x387   :  { %v711_v30 = vpop.f32.mrf.mxu1 }
 0x388   :  { %v1510_v31 = vpop.eup %1509  ;;  %v827_v30 = vld [vmem:[#allocation2 + $0x18] sm:$0xff] }
 0x389   :  { %v717_v33 = vmul.f32 %v1510_v31, %v656_v27 }
 0x38a   :  { %v418_v42 = vpop.permute.xlu1 %417 }
 0x38b   :  { %v718_v35 = vadd.f32 %v717_v33, %v716_v32  ;;  %434 = vst.msk [vmem:[#allocation4 + $0x38] sm:$0xff] %vm44_vm2, %v418_v42 }
 0x38d   :  { %1426 = vst.msk [vmem:[%s2076_s11 + $0x8] sm:$0xff] %vm44_vm2, %v718_v35  ;;  %v1954_v38 = vmul.f32 %v722_v36, %v718_v35 }
 0x38f   :  { %v724_v39 = vpack.c.bf16 %v1954_v38, %v1954_v38 }
 0x391   :  { %1427 = vmatmul.msk.bf16.vlgmr.msrb.gmra.mxu2 %vm44_vm2, %v724_v39  ;;  %1429 = vmatmul.msk.bf16.vlgmr.msra.gmra.mxu3 %vm44_vm2, %v724_v39 }
 0x392   :  { %1021 = vmatpush.bf16.msrb.mxu2 %v1763_v8  ;;  %1051 = vmatpush.bf16.msra.mxu3 %v1704_v48 }
 0x396   :  { %1022 = vmatpush.bf16.msrb.mxu2 %v1769_v10  ;;  %1052 = vmatpush.bf16.msra.mxu3 %v1711_v49 }
 0x414   :  { %v739_v43 = vpop.f32.mrf.mxu2  ;;  %v774_v45 = vpop.f32.mrf.mxu3 }
 0x415   :  { %v778_v46 = vadd.f32 %v774_v45, %v764_v44  ;;  %v743_v6 = vadd.f32 %v739_v43, %v726_v5 }
 0x417   :  { %v1430_v47 = vmul.f32 -1.442695, %v778_v46  ;;  %v1428_v7 = vmul.f32 -1.442695, %v743_v6  ;;  %v904_v6 = vld [vmem:[#allocation5 + $0x18] sm:$0xff] }
 0x419   :  { %1511 = vpow2.f32 %v1430_v47 }
 0x41c   :  { %v741_v52 = vpop.f32.mrf.mxu2  ;;  %v776_v55 = vpop.f32.mrf.mxu3 }
 0x41f   :  { %v1512_v53 = vpop.eup %1511 }
 0x420   :  { %v782_v56 = vadd.f32 1.0, %v1512_v53  ;;  %v1994_v53 = vld [vmem:[%s2074_s8 + $0x8] sm:$0xff] }
 0x422   :  { %1513 = vrcp.f32 %v782_v56  ;;  %v794_v61 = vand.u32 2147483648, %v782_v56  ;;  %v792_v63 = vand.u32 2147483647, %v782_v56  ;;  %vm788_vm5 = vweird.f32 %v782_v56 }
 0x423   :  { %1515 = vpow2.f32 %v1428_v7 }
 0x424   :  { %v795_v0 = vor.u32 1.1754944e-38, %v794_v61  ;;  %vm793_vm7 = vcmp.eq.f32.partialorder %v792_v63, 8.507059e+37 }
 0x428   :  { %v1514_v57 = vpop.eup %1513 }
 0x429   :  { %v784_v59 = vmul.f32 %v1514_v57, %v782_v56  ;;  %vm789_vm4 = vweird.f32 %v1514_v57  ;;  %v1516_v9 = vpop.eup %1515  ;;  %v2000_v56 = vld [vmem:[%s2074_s8] sm:$0xff] }
 0x42a   :  { %vm790_vm6 = vmor %vm788_vm5, %vm789_vm4  ;;  %v747_v11 = vadd.f32 1.0, %v1516_v9 }
 0x42b   :  { %v785_v60 = vsub.f32 1.0, %v784_v59 }
 0x42c   :  { %1517 = vrcp.f32 %v747_v11  ;;  %v759_v17 = vand.u32 2147483648, %v747_v11  ;;  %vm753_vm9 = vweird.f32 %v747_v11  ;;  %v757_v18 = vand.u32 2147483647, %v747_v11 }
 0x42d   :  { %v786_v62 = vmul.f32 %v1514_v57, %v785_v60 }
 0x42e   :  { %v760_v20 = vor.u32 1.1754944e-38, %v759_v17  ;;  %vm758_vm11 = vcmp.eq.f32.partialorder %v757_v18, 8.507059e+37 }
 0x42f   :  { %v787_v25 = vadd.f32 %v1514_v57, %v786_v62 }
 0x431   :  { %v791_v1 = vsel %vm790_vm6, %v1514_v57, %v787_v25  ;;  %v831_v57 = vld [vmem:[#allocation3 + $0x18] sm:$0xff] }
 0x432   :  { %v796_v2 = vsel %vm793_vm7, %v795_v0, %v791_v1  ;;  %v1518_v13 = vpop.eup %1517 }
 0x433   :  { %v800_v3 = vmul.f32 %v796_v2, %v1954_v38  ;;  %v749_v58 = vmul.f32 %v1518_v13, %v747_v11  ;;  %vm754_vm8 = vweird.f32 %v1518_v13 }
 0x434   :  { %vm755_vm10 = vmor %vm753_vm9, %vm754_vm8 }
 0x435   :  { %v801_v4 = vpack.c.bf16 %v800_v3, %v800_v3  ;;  %v750_v14 = vsub.f32 1.0, %v749_v58 }
 0x437   :  { %1431 = vmatmul.msk.bf16.vlgmr.msra.gmra.mxu0 %vm44_vm2, %v801_v4  ;;  %v751_v15 = vmul.f32 %v1518_v13, %v750_v14 }
 0x438   :  { %1086 = vmatpush.bf16.msra.mxu0 %v1719_v50 }
 0x439   :  { %v752_v16 = vadd.f32 %v1518_v13, %v751_v15 }
 0x43b   :  { %v756_v50 = vsel %vm755_vm10, %v1518_v13, %v752_v16 }
 0x43c   :  { %1087 = vmatpush.bf16.msra.mxu0 %v1725_v51  ;;  %v761_v22 = vsel %vm758_vm11, %v760_v20, %v756_v50  ;;  %v932_v50 = vld [vmem:[#allocation2 + $0x20] sm:$0xff]  ;;  %v1573_v20 = vld [vmem:[%s2073_s7 + $0x8] sm:$0xff] }
 0x43d   :  { %v820_v23 = vsub.f32 1.0, %v761_v22 }
 0x43f   :  { %v821_v27 = vmul.f32 %v820_v23, %v1954_v38  ;;  %v974_v23 = vld [vmem:[#allocation4 + $0x20] sm:$0xff] }
 0x4b4   :  { %v814_v51 = vpop.f32.mrf.mxu0 }
 0x4b5   :  { %v818_v21 = vadd.f32 %v814_v51, %v799_v19 }
 0x4b7   :  { %1519 = vtanh.f32 %v818_v21  ;;  %v1574_v21 = vld [vmem:[%s2073_s7] sm:$0xff] }
 0x4bc   :  { %v816_v24 = vpop.f32.mrf.mxu0 }
 0x4bd   :  { %v1520_v26 = vpop.eup %1519 }
 0x4be   :  { %v822_v28 = vmul.f32 %v1520_v26, %v761_v22 }
 0x4c0   :  { %v823_v29 = vadd.f32 %v822_v28, %v821_v27 }
 0x4c2   :  { %1432 = vst.msk [vmem:[%s2076_s11 + $0x10] sm:$0xff] %vm44_vm2, %v823_v29  ;;  %v1979_v31 = vmul.f32 %v827_v30, %v823_v29 }
 0x4c4   :  { %v829_v32 = vpack.c.bf16 %v1979_v31, %v1979_v31 }
 0x4c6   :  { %1433 = vmatmul.msk.bf16.vlgmr.msra.gmra.mxu1 %vm44_vm2, %v829_v32  ;;  %1435 = vmatmul.msk.bf16.vlgmr.msra.gmra.mxu2 %vm44_vm2, %v829_v32 }
 0x4c7   :  { %1126 = vmatpush.bf16.msra.mxu1 %v1763_v8  ;;  %1156 = vmatpush.bf16.msra.mxu2 %v1704_v48 }
 0x4cb   :  { %1127 = vmatpush.bf16.msra.mxu1 %v1769_v10  ;;  %1157 = vmatpush.bf16.msra.mxu2 %v1711_v49 }
 0x543   :  { %v844_v33 = vpop.f32.mrf.mxu1 }
 0x544   :  { %v848_v59 = vadd.f32 %v844_v33, %v831_v57  ;;  %v1009_v57 = vld [vmem:[#allocation5 + $0x20] sm:$0xff] }
 0x546   :  { %v1434_v60 = vmul.f32 -1.442695, %v848_v59 }
 0x549   :  { %v879_v35 = vpop.f32.mrf.mxu2 }
 0x54a   :  { %v883_v36 = vadd.f32 %v879_v35, %v869_v34 }
 0x54b   :  { %v846_v37 = vpop.f32.mrf.mxu1 }
 0x54c   :  { %v1436_v38 = vmul.f32 -1.442695, %v883_v36 }
 0x54e   :  { %1521 = vpow2.f32 %v1436_v38 }
 0x551   :  { %v881_v39 = vpop.f32.mrf.mxu2 }
 0x554   :  { %v1522_v54 = vpop.eup %1521 }
 0x555   :  { %v887_v12 = vadd.f32 1.0, %v1522_v54 }
 0x557   :  { %1523 = vrcp.f32 %v887_v12  ;;  %v899_v43 = vand.u32 2147483648, %v887_v12  ;;  %v897_v44 = vand.u32 2147483647, %v887_v12  ;;  %vm893_vm13 = vweird.f32 %v887_v12 }
 0x558   :  { %1525 = vpow2.f32 %v1434_v60 }
 0x559   :  { %v900_v45 = vor.u32 1.1754944e-38, %v899_v43  ;;  %vm898_vm15 = vcmp.eq.f32.partialorder %v897_v44, 8.507059e+37 }
 0x55d   :  { %v1524_v40 = vpop.eup %1523 }
 0x55e   :  { %v889_v41 = vmul.f32 %v1524_v40, %v887_v12  ;;  %vm894_vm12 = vweird.f32 %v1524_v40  ;;  %v1526_v61 = vpop.eup %1525 }
 0x55f   :  { %vm895_vm14 = vmor %vm893_vm13, %vm894_vm12  ;;  %v852_v62 = vadd.f32 1.0, %v1526_v61 }
 0x560   :  { %v890_v42 = vsub.f32 1.0, %v889_v41 }
 0x561   :  { %1527 = vrcp.f32 %v852_v62  ;;  %v864_v3 = vand.u32 2147483648, %v852_v62  ;;  %vm858_vm1 = vweird.f32 %v852_v62  ;;  %v862_v4 = vand.u32 2147483647, %v852_v62 }
 0x562   :  { %v891_v48 = vmul.f32 %v1524_v40, %v890_v42 }
 0x563   :  { %v865_v9 = vor.u32 1.1754944e-38, %v864_v3  ;;  %vm863_vm4 = vcmp.eq.f32.partialorder %v862_v4, 8.507059e+37  ;;  %v1037_v3 = vld [vmem:[#allocation2 + $0x28] sm:$0xff] }
 0x564   :  { %v892_v49 = vadd.f32 %v1524_v40, %v891_v48 }
 0x566   :  { %v896_v46 = vsel %vm895_vm14, %v1524_v40, %v892_v49  ;;  %v936_v40 = vld [vmem:[#allocation3 + $0x20] sm:$0xff] }
 0x567   :  { %v901_v47 = vsel %vm898_vm15, %v900_v45, %v896_v46  ;;  %v1528_v63 = vpop.eup %1527 }
 0x568   :  { %v905_v52 = vmul.f32 %v901_v47, %v1979_v31  ;;  %v854_v25 = vmul.f32 %v1528_v63, %v852_v62  ;;  %vm859_vm0 = vweird.f32 %v1528_v63 }
 0x569   :  { %vm860_vm3 = vmor %vm858_vm1, %vm859_vm0 }
 0x56a   :  { %v906_v55 = vpack.c.bf16 %v905_v52, %v905_v52  ;;  %v855_v0 = vsub.f32 1.0, %v854_v25 }
 0x56c   :  { %1437 = vmatmul.msk.bf16.vlgmr.msrb.gmra.mxu3 %vm44_vm2, %v906_v55  ;;  %v856_v1 = vmul.f32 %v1528_v63, %v855_v0 }
 0x56d   :  { %1191 = vmatpush.bf16.msrb.mxu3 %v1994_v53 }
 0x56e   :  { %v857_v2 = vadd.f32 %v1528_v63, %v856_v1 }
 0x570   :  { %v861_v5 = vsel %vm860_vm3, %v1528_v63, %v857_v2 }
 0x571   :  { %1192 = vmatpush.bf16.msrb.mxu3 %v2000_v56  ;;  %v866_v13 = vsel %vm863_vm4, %v865_v9, %v861_v5  ;;  %v1079_v9 = vld [vmem:[#allocation4 + $0x28] sm:$0xff] }
 0x572   :  { %v925_v58 = vsub.f32 1.0, %v866_v13 }
 0x574   :  { %v926_v16 = vmul.f32 %v925_v58, %v1979_v31 }
 0x5ef   :  { %v919_v7 = vpop.f32.mrf.mxu3 }
 0x5f0   :  { %v923_v11 = vadd.f32 %v919_v7, %v904_v6  ;;  %v1575_v6 = vld [vmem:[%s2075_s9 + $0x8] sm:$0xff]  ;;  %v1576_v7 = vld [vmem:[%s2075_s9] sm:$0xff] }
 0x5f2   :  { %1529 = vtanh.f32 %v923_v11 }
 0x5f7   :  { %v921_v14 = vpop.f32.mrf.mxu3 }
 0x5f8   :  { %v1530_v15 = vpop.eup %1529 }
 0x5f9   :  { %v927_v17 = vmul.f32 %v1530_v15, %v866_v13 }
 0x5fb   :  { %v928_v18 = vadd.f32 %v927_v17, %v926_v16 }
 0x5fd   :  { %1438 = vst.msk [vmem:[%s2076_s11 + $0x18] sm:$0xff] %vm44_vm2, %v928_v18  ;;  %v2008_v19 = vmul.f32 %v932_v50, %v928_v18 }
 0x5ff   :  { %v934_v51 = vpack.c.bf16 %v2008_v19, %v2008_v19 }
 0x601   :  { %1439 = vmatmul.msk.bf16.vlgmr.msrb.gmra.mxu0 %vm44_vm2, %v934_v51  ;;  %1441 = vmatmul.msk.bf16.vlgmr.msrb.gmra.mxu1 %vm44_vm2, %v934_v51 }
 0x602   :  { %1231 = vmatpush.bf16.msrb.mxu0 %v1763_v8  ;;  %1261 = vmatpush.bf16.msrb.mxu1 %v1573_v20 }
 0x606   :  { %1232 = vmatpush.bf16.msrb.mxu0 %v1769_v10  ;;  %1262 = vmatpush.bf16.msrb.mxu1 %v1574_v21 }
 0x67e   :  { %v949_v22 = vpop.f32.mrf.mxu0  ;;  %v984_v24 = vpop.f32.mrf.mxu1 }
 0x67f   :  { %v988_v26 = vadd.f32 %v984_v24, %v974_v23  ;;  %v953_v41 = vadd.f32 %v949_v22, %v936_v40 }
 0x681   :  { %v1442_v27 = vmul.f32 -1.442695, %v988_v26  ;;  %v1440_v42 = vmul.f32 -1.442695, %v953_v41 }
 0x683   :  { %1531 = vpow2.f32 %v1442_v27 }
 0x686   :  { %v951_v28 = vpop.f32.mrf.mxu0  ;;  %v986_v8 = vpop.f32.mrf.mxu1 }
 0x689   :  { %v1532_v29 = vpop.eup %1531 }
 0x68a   :  { %v992_v30 = vadd.f32 1.0, %v1532_v29  ;;  %v1041_v29 = vld [vmem:[#allocation3 + $0x28] sm:$0xff] }
 0x68c   :  { %1533 = vrcp.f32 %v992_v30  ;;  %v1004_v10 = vand.u32 2147483648, %v992_v30  ;;  %v1002_v35 = vand.u32 2147483647, %v992_v30  ;;  %vm998_vm6 = vweird.f32 %v992_v30 }
 0x68d   :  { %1535 = vpow2.f32 %v1440_v42 }
 0x68e   :  { %v1005_v37 = vor.u32 1.1754944e-38, %v1004_v10  ;;  %vm1003_vm8 = vcmp.eq.f32.partialorder %v1002_v35, 8.507059e+37 }
 0x692   :  { %v1534_v31 = vpop.eup %1533 }
 0x693   :  { %v994_v32 = vmul.f32 %v1534_v31, %v992_v30  ;;  %vm999_vm5 = vweird.f32 %v1534_v31  ;;  %v1536_v43 = vpop.eup %1535 }
 0x694   :  { %vm1000_vm7 = vmor %vm998_vm6, %vm999_vm5  ;;  %v957_v48 = vadd.f32 1.0, %v1536_v43 }
 0x695   :  { %v995_v33 = vsub.f32 1.0, %v994_v32 }
 0x696   :  { %1537 = vrcp.f32 %v957_v48  ;;  %v969_v52 = vand.u32 2147483648, %v957_v48  ;;  %vm963_vm10 = vweird.f32 %v957_v48  ;;  %v967_v55 = vand.u32 2147483647, %v957_v48 }
 0x697   :  { %v996_v34 = vmul.f32 %v1534_v31, %v995_v33 }
 0x698   :  { %v970_v59 = vor.u32 1.1754944e-38, %v969_v52  ;;  %vm968_vm12 = vcmp.eq.f32.partialorder %v967_v55, 8.507059e+37  ;;  %v1142_v52 = vld [vmem:[#allocation2 + $0x30] sm:$0xff] }
 0x699   :  { %v997_v36 = vadd.f32 %v1534_v31, %v996_v34 }
 0x69b   :  { %v1001_v38 = vsel %vm1000_vm7, %v1534_v31, %v997_v36 }
 0x69c   :  { %v1006_v39 = vsel %vm1003_vm8, %v1005_v37, %v1001_v38  ;;  %v1538_v44 = vpop.eup %1537 }
 0x69d   :  { %v1010_v54 = vmul.f32 %v1006_v39, %v2008_v19  ;;  %v959_v49 = vmul.f32 %v1538_v44, %v957_v48  ;;  %vm964_vm9 = vweird.f32 %v1538_v44 }
 0x69e   :  { %vm965_vm11 = vmor %vm963_vm10, %vm964_vm9 }
 0x69f   :  { %v1011_v12 = vpack.c.bf16 %v1010_v54, %v1010_v54  ;;  %v960_v45 = vsub.f32 1.0, %v959_v49 }
 0x6a1   :  { %1443 = vmatmul.msk.bf16.vlgmr.msrb.gmra.mxu2 %vm44_vm2, %v1011_v12  ;;  %v961_v46 = vmul.f32 %v1538_v44, %v960_v45  ;;  %v1114_v12 = vld [vmem:[#allocation5 + $0x28] sm:$0xff] }
 0x6a2   :  { %1296 = vmatpush.bf16.msrb.mxu2 %v1994_v53 }
 0x6a3   :  { %v962_v47 = vadd.f32 %v1538_v44, %v961_v46 }
 0x6a5   :  { %v966_v53 = vsel %vm965_vm11, %v1538_v44, %v962_v47 }
 0x6a6   :  { %1297 = vmatpush.bf16.msrb.mxu2 %v2000_v56  ;;  %v971_v61 = vsel %vm968_vm12, %v970_v59, %v966_v53 }
 0x6a7   :  { %v1030_v62 = vsub.f32 1.0, %v971_v61 }
 0x6a9   :  { %v1031_v0 = vmul.f32 %v1030_v62, %v2008_v19 }
 0x724   :  { %v1024_v56 = vpop.f32.mrf.mxu2 }
 0x725   :  { %v1028_v60 = vadd.f32 %v1024_v56, %v1009_v57  ;;  %v1184_v56 = vld [vmem:[#allocation4 + $0x30] sm:$0xff] }
 0x727   :  { %1539 = vtanh.f32 %v1028_v60 }
 0x72c   :  { %v1026_v63 = vpop.f32.mrf.mxu2 }
 0x72d   :  { %v1540_v25 = vpop.eup %1539 }
 0x72e   :  { %v1032_v1 = vmul.f32 %v1540_v25, %v971_v61 }
 0x730   :  { %v1033_v2 = vadd.f32 %v1032_v1, %v1031_v0 }
 0x732   :  { %1444 = vst.msk [vmem:[%s2076_s11 + $0x20] sm:$0xff] %vm44_vm2, %v1033_v2  ;;  %v2031_v4 = vmul.f32 %v1037_v3, %v1033_v2 }
 0x734   :  { %v1039_v5 = vpack.c.bf16 %v2031_v4, %v2031_v4 }
 0x736   :  { %1445 = vmatmul.msk.bf16.vlgmr.msra.gmra.mxu3 %vm44_vm2, %v1039_v5  ;;  %1447 = vmatmul.msk.bf16.vlgmr.msra.gmra.mxu0 %vm44_vm2, %v1039_v5 }
 0x737   :  { %1336 = vmatpush.bf16.msra.mxu3 %v1575_v6 }
 0x73b   :  { %1337 = vmatpush.bf16.msra.mxu3 %v1576_v7 }
 0x7b3   :  { %v1089_v11 = vpop.f32.mrf.mxu0 }
 0x7b4   :  { %v1093_v13 = vadd.f32 %v1089_v11, %v1079_v9 }
 0x7b6   :  { %v1448_v58 = vmul.f32 -1.442695, %v1093_v13 }
 0x7b8   :  { %1541 = vpow2.f32 %v1448_v58 }
 0x7b9   :  { %v1054_v14 = vpop.f32.mrf.mxu3 }
 0x7ba   :  { %v1058_v30 = vadd.f32 %v1054_v14, %v1041_v29 }
 0x7bb   :  { %v1091_v15 = vpop.f32.mrf.mxu0 }
 0x7bc   :  { %v1446_v31 = vmul.f32 -1.442695, %v1058_v30  ;;  %v1146_v15 = vld [vmem:[#allocation3 + $0x30] sm:$0xff] }
 0x7be   :  { %v1542_v16 = vpop.eup %1541 }
 0x7bf   :  { %v1097_v17 = vadd.f32 1.0, %v1542_v16 }
 0x7c1   :  { %1543 = vrcp.f32 %v1097_v17  ;;  %v1056_v18 = vpop.f32.mrf.mxu3  ;;  %v1109_v20 = vand.u32 2147483648, %v1097_v17  ;;  %v1107_v22 = vand.u32 2147483647, %v1097_v17  ;;  %vm1103_vm14 = vweird.f32 %v1097_v17 }
 0x7c2   :  { %1545 = vpow2.f32 %v1446_v31 }
 0x7c3   :  { %v1110_v24 = vor.u32 1.1754944e-38, %v1109_v20  ;;  %vm1108_vm0 = vcmp.eq.f32.partialorder %v1107_v22, 8.507059e+37 }
 0x7c7   :  { %v1544_v50 = vpop.eup %1543 }
 0x7c8   :  { %v1099_v19 = vmul.f32 %v1544_v50, %v1097_v17  ;;  %vm1104_vm13 = vweird.f32 %v1544_v50  ;;  %v1546_v32 = vpop.eup %1545 }
 0x7c9   :  { %vm1105_vm15 = vmor %vm1103_vm14, %vm1104_vm13  ;;  %v1062_v33 = vadd.f32 1.0, %v1546_v32 }
 0x7ca   :  { %v1100_v51 = vsub.f32 1.0, %v1099_v19 }
 0x7cb   :  { %1547 = vrcp.f32 %v1062_v33  ;;  %v1074_v38 = vand.u32 2147483648, %v1062_v33  ;;  %vm1068_vm3 = vweird.f32 %v1062_v33  ;;  %v1072_v39 = vand.u32 2147483647, %v1062_v33 }
 0x7cc   :  { %v1101_v21 = vmul.f32 %v1544_v50, %v1100_v51 }
 0x7cd   :  { %v1075_v41 = vor.u32 1.1754944e-38, %v1074_v38  ;;  %vm1073_vm5 = vcmp.eq.f32.partialorder %v1072_v39, 8.507059e+37 }
 0x7ce   :  { %v1102_v23 = vadd.f32 %v1544_v50, %v1101_v21 }
 0x7d0   :  { %v1106_v26 = vsel %vm1105_vm15, %v1544_v50, %v1102_v23 }
 0x7d1   :  { %v1111_v27 = vsel %vm1108_vm0, %v1110_v24, %v1106_v26  ;;  %v1548_v10 = vpop.eup %1547 }
 0x7d2   :  { %v1115_v28 = vmul.f32 %v1111_v27, %v2031_v4  ;;  %v1064_v34 = vmul.f32 %v1548_v10, %v1062_v33  ;;  %vm1069_vm1 = vweird.f32 %v1548_v10  ;;  %v1219_v27 = vld [vmem:[#allocation5 + $0x30] sm:$0xff] }
 0x7d3   :  { %vm1070_vm4 = vmor %vm1068_vm3, %vm1069_vm1 }
 0x7d4   :  { %v1116_v8 = vpack.c.bf16 %v1115_v28, %v1115_v28  ;;  %v1065_v35 = vsub.f32 1.0, %v1064_v34 }
 0x7d6   :  { %1449 = vmatmul.msk.bf16.vlgmr.msra.gmra.mxu1 %vm44_vm2, %v1116_v8  ;;  %v1066_v36 = vmul.f32 %v1548_v10, %v1065_v35 }
 0x7d8   :  { %v1067_v37 = vadd.f32 %v1548_v10, %v1066_v36  ;;  %v1247_v36 = vld [vmem:[#allocation2 + $0x38] sm:$0xff] }
 0x7da   :  { %v1071_v54 = vsel %vm1070_vm4, %v1548_v10, %v1067_v37 }
 0x7db   :  { %v1076_v43 = vsel %vm1073_vm5, %v1075_v41, %v1071_v54  ;;  %v1289_v54 = vld [vmem:[#allocation4 + $0x38] sm:$0xff] }
 0x7dc   :  { %v1135_v48 = vsub.f32 1.0, %v1076_v43 }
 0x7de   :  { %v1136_v45 = vmul.f32 %v1135_v48, %v2031_v4 }
 0x853   :  { %v1129_v40 = vpop.f32.mrf.mxu1 }
 0x854   :  { %v1133_v42 = vadd.f32 %v1129_v40, %v1114_v12 }
 0x856   :  { %1549 = vtanh.f32 %v1133_v42 }
 0x85b   :  { %v1131_v44 = vpop.f32.mrf.mxu1 }
 0x85c   :  { %v1550_v49 = vpop.eup %1549 }
 0x85d   :  { %v1137_v46 = vmul.f32 %v1550_v49, %v1076_v43 }
 0x85f   :  { %v1138_v47 = vadd.f32 %v1137_v46, %v1136_v45 }
 0x861   :  { %1450 = vst.msk [vmem:[%s2076_s11 + $0x28] sm:$0xff] %vm44_vm2, %v1138_v47  ;;  %v1143_v55 = vmul.f32 %v1142_v52, %v1138_v47 }
 0x863   :  { %v1144_v53 = vpack.c.bf16 %v1143_v55, %v1143_v55 }
 0x865   :  { %1451 = vmatmul.msk.bf16.vlgmr.msra.gmra.mxu2 %vm44_vm2, %v1144_v53  ;;  %1453 = vmatmul.msk.bf16.vlgmr.msrb.gmra.mxu3 %vm44_vm2, %v1144_v53 }
 0x8e8   :  { %v1159_v57 = vpop.f32.mrf.mxu2  ;;  %v1194_v59 = vpop.f32.mrf.mxu3 }
 0x8e9   :  { %v1198_v60 = vadd.f32 %v1194_v59, %v1184_v56  ;;  %v1163_v16 = vadd.f32 %v1159_v57, %v1146_v15 }
 0x8eb   :  { %v1454_v61 = vmul.f32 -1.442695, %v1198_v60  ;;  %v1452_v17 = vmul.f32 -1.442695, %v1163_v16 }
 0x8ed   :  { %1551 = vpow2.f32 %v1454_v61 }
 0x8f0   :  { %v1161_v62 = vpop.f32.mrf.mxu2  ;;  %v1196_v63 = vpop.f32.mrf.mxu3 }
 0x8f1   :  { %v1251_v62 = vld [vmem:[#allocation3 + $0x38] sm:$0xff] }
 0x8f3   :  { %v1552_v25 = vpop.eup %1551 }
 0x8f4   :  { %v1202_v0 = vadd.f32 1.0, %v1552_v25 }
 0x8f6   :  { %1553 = vrcp.f32 %v1202_v0  ;;  %v1214_v4 = vand.u32 2147483648, %v1202_v0  ;;  %v1212_v6 = vand.u32 2147483647, %v1202_v0  ;;  %vm1208_vm7 = vweird.f32 %v1202_v0 }
 0x8f7   :  { %1555 = vpow2.f32 %v1452_v17 }
 0x8f8   :  { %v1215_v9 = vor.u32 1.1754944e-38, %v1214_v4  ;;  %vm1213_vm9 = vcmp.eq.f32.partialorder %v1212_v6, 8.507059e+37 }
 0x8fc   :  { %v1554_v1 = vpop.eup %1553 }
 0x8fd   :  { %v1204_v2 = vmul.f32 %v1554_v1, %v1202_v0  ;;  %vm1209_vm6 = vweird.f32 %v1554_v1  ;;  %v1556_v18 = vpop.eup %1555 }
 0x8fe   :  { %vm1210_vm8 = vmor %vm1208_vm7, %vm1209_vm6  ;;  %v1167_v50 = vadd.f32 1.0, %v1556_v18 }
 0x8ff   :  { %v1205_v3 = vsub.f32 1.0, %v1204_v2 }
 0x900   :  { %1557 = vrcp.f32 %v1167_v50  ;;  %v1179_v23 = vand.u32 2147483648, %v1167_v50  ;;  %vm1173_vm11 = vweird.f32 %v1167_v50  ;;  %v1177_v24 = vand.u32 2147483647, %v1167_v50 }
 0x901   :  { %v1206_v5 = vmul.f32 %v1554_v1, %v1205_v3 }
 0x902   :  { %v1180_v8 = vor.u32 1.1754944e-38, %v1179_v23  ;;  %vm1178_vm13 = vcmp.eq.f32.partialorder %v1177_v24, 8.507059e+37 }
 0x903   :  { %v1207_v7 = vadd.f32 %v1554_v1, %v1206_v5 }
 0x905   :  { %v1211_v11 = vsel %vm1210_vm8, %v1554_v1, %v1207_v7 }
 0x906   :  { %v1216_v13 = vsel %vm1213_vm9, %v1215_v9, %v1211_v11  ;;  %v1558_v19 = vpop.eup %1557 }
 0x907   :  { %v1220_v58 = vmul.f32 %v1216_v13, %v1143_v55  ;;  %v1169_v51 = vmul.f32 %v1558_v19, %v1167_v50  ;;  %vm1174_vm10 = vweird.f32 %v1558_v19  ;;  %v1324_v13 = vld [vmem:[#allocation5 + $0x38] sm:$0xff] }
 0x908   :  { %vm1175_vm12 = vmor %vm1173_vm11, %vm1174_vm10 }
 0x909   :  { %v1221_v14 = vpack.c.bf16 %v1220_v58, %v1220_v58  ;;  %v1170_v20 = vsub.f32 1.0, %v1169_v51 }
 0x90b   :  { %1455 = vmatmul.msk.bf16.vlgmr.msrb.gmra.mxu0 %vm44_vm2, %v1221_v14  ;;  %v1171_v21 = vmul.f32 %v1558_v19, %v1170_v20 }
 0x90d   :  { %v1172_v22 = vadd.f32 %v1558_v19, %v1171_v21 }
 0x90f   :  { %v1176_v26 = vsel %vm1175_vm12, %v1558_v19, %v1172_v22 }
 0x910   :  { %v1181_v30 = vsel %vm1178_vm13, %v1180_v8, %v1176_v26 }
 0x911   :  { %v1240_v31 = vsub.f32 1.0, %v1181_v30 }
 0x913   :  { %v1241_v10 = vmul.f32 %v1240_v31, %v1143_v55 }
 0x988   :  { %v1234_v28 = vpop.f32.mrf.mxu0 }
 0x989   :  { %v1238_v29 = vadd.f32 %v1234_v28, %v1219_v27 }
 0x98b   :  { %1559 = vtanh.f32 %v1238_v29 }
 0x990   :  { %v1236_v32 = vpop.f32.mrf.mxu0 }
 0x991   :  { %v1560_v33 = vpop.eup %1559 }
 0x992   :  { %v1242_v34 = vmul.f32 %v1560_v33, %v1181_v30 }
 0x994   :  { %v1243_v35 = vadd.f32 %v1242_v34, %v1241_v10 }
 0x996   :  { %1456 = vst.msk [vmem:[%s2076_s11 + $0x30] sm:$0xff] %vm44_vm2, %v1243_v35  ;;  %v1248_v37 = vmul.f32 %v1247_v36, %v1243_v35 }
 0x998   :  { %v1249_v38 = vpack.c.bf16 %v1248_v37, %v1248_v37 }
 0x99a   :  { %1457 = vmatmul.msk.bf16.vlgmr.msrb.gmra.mxu1 %vm44_vm2, %v1249_v38  ;;  %1459 = vmatmul.msk.bf16.vlgmr.msrb.gmra.mxu2 %vm44_vm2, %v1249_v38 }
 0xa17   :  { %v1264_v39 = vpop.f32.mrf.mxu1 }
 0xa18   :  { %v1268_v63 = vadd.f32 %v1264_v39, %v1251_v62 }
 0xa1a   :  { %v1458_v25 = vmul.f32 -1.442695, %v1268_v63 }
 0xa1d   :  { %v1299_v12 = vpop.f32.mrf.mxu2 }
 0xa1e   :  { %v1303_v40 = vadd.f32 %v1299_v12, %v1289_v54 }
 0xa1f   :  { %v1266_v41 = vpop.f32.mrf.mxu1 }
 0xa20   :  { %v1460_v42 = vmul.f32 -1.442695, %v1303_v40 }
 0xa22   :  { %1561 = vpow2.f32 %v1460_v42 }
 0xa25   :  { %v1301_v43 = vpop.f32.mrf.mxu2 }
 0xa28   :  { %v1562_v48 = vpop.eup %1561 }
 0xa29   :  { %v1307_v44 = vadd.f32 1.0, %v1562_v48 }
 0xa2b   :  { %1563 = vrcp.f32 %v1307_v44  ;;  %v1319_v47 = vand.u32 2147483648, %v1307_v44  ;;  %v1317_v55 = vand.u32 2147483647, %v1307_v44  ;;  %vm1313_vm15 = vweird.f32 %v1307_v44 }
 0xa2c   :  { %1565 = vpow2.f32 %v1458_v25 }
 0xa2d   :  { %v1320_v57 = vor.u32 1.1754944e-38, %v1319_v47  ;;  %vm1318_vm1 = vcmp.eq.f32.partialorder %v1317_v55, 8.507059e+37 }
 0xa31   :  { %v1564_v49 = vpop.eup %1563 }
 0xa32   :  { %v1309_v45 = vmul.f32 %v1564_v49, %v1307_v44  ;;  %vm1314_vm14 = vweird.f32 %v1564_v49  ;;  %v1566_v0 = vpop.eup %1565 }
 0xa33   :  { %vm1315_vm0 = vmor %vm1313_vm15, %vm1314_vm14  ;;  %v1272_v1 = vadd.f32 1.0, %v1566_v0 }
 0xa34   :  { %v1310_v46 = vsub.f32 1.0, %v1309_v45 }
 0xa35   :  { %1567 = vrcp.f32 %v1272_v1  ;;  %v1284_v7 = vand.u32 2147483648, %v1272_v1  ;;  %vm1278_vm4 = vweird.f32 %v1272_v1  ;;  %v1282_v9 = vand.u32 2147483647, %v1272_v1 }
 0xa36   :  { %v1311_v52 = vmul.f32 %v1564_v49, %v1310_v46 }
 0xa37   :  { %v1285_v14 = vor.u32 1.1754944e-38, %v1284_v7  ;;  %vm1283_vm6 = vcmp.eq.f32.partialorder %v1282_v9, 8.507059e+37 }
 0xa38   :  { %v1312_v53 = vadd.f32 %v1564_v49, %v1311_v52 }
 0xa3a   :  { %v1316_v56 = vsel %vm1315_vm0, %v1564_v49, %v1312_v53 }
 0xa3b   :  { %v1321_v59 = vsel %vm1318_vm1, %v1320_v57, %v1316_v56  ;;  %v1568_v2 = vpop.eup %1567 }
 0xa3c   :  { %v1325_v60 = vmul.f32 %v1321_v59, %v1248_v37  ;;  %v1274_v3 = vmul.f32 %v1568_v2, %v1272_v1  ;;  %vm1279_vm3 = vweird.f32 %v1568_v2 }
 0xa3d   :  { %vm1280_vm5 = vmor %vm1278_vm4, %vm1279_vm3 }
 0xa3e   :  { %v1326_v61 = vpack.c.bf16 %v1325_v60, %v1325_v60  ;;  %v1275_v4 = vsub.f32 1.0, %v1274_v3 }
 0xa40   :  { %1461 = vmatmul.msk.bf16.vlgmr.msra.gmra.mxu3 %vm44_vm2, %v1326_v61  ;;  %v1276_v5 = vmul.f32 %v1568_v2, %v1275_v4 }
 0xa42   :  { %v1277_v6 = vadd.f32 %v1568_v2, %v1276_v5 }
 0xa44   :  { %v1281_v11 = vsel %vm1280_vm5, %v1568_v2, %v1277_v6 }
 0xa45   :  { %v1286_v16 = vsel %vm1283_vm6, %v1285_v14, %v1281_v11 }
 0xa46   :  { %v1345_v17 = vsub.f32 1.0, %v1286_v16 }
 0xa48   :  { %v1346_v19 = vmul.f32 %v1345_v17, %v1248_v37 }
 0xac3   :  { %v1339_v58 = vpop.f32.mrf.mxu3 }
 0xac4   :  { %v1343_v15 = vadd.f32 %v1339_v58, %v1324_v13 }
 0xac6   :  { %1569 = vtanh.f32 %v1343_v15 }
 0xacb   :  { %v1341_v18 = vpop.f32.mrf.mxu3 }
 0xacc   :  { %v1570_v50 = vpop.eup %1569 }
 0xacd   :  { %v1347_v51 = vmul.f32 %v1570_v50, %v1286_v16 }
 0xacf   :  { %v1348_v20 = vadd.f32 %v1347_v51, %v1346_v19 }
 0xad1   :  { %1462 = vst.msk [vmem:[%s2076_s11 + $0x38] sm:$0xff] %vm44_vm2, %v1348_v20 }
 0xad2   :  { %1351 = vst.msk [vmem:[#allocation6] sm:$0xff] %vm44_vm2, %v1348_v20 }

</bundles_post_ra>
